<compile_context>
chip_gen: v6e
topology: v6e:2x2x1
jax: 0.10.0
libtpu: 0.0.40
codegen_flags: <defaults>
</compile_context>

<pallas_src>
import jax
import jax.numpy as jnp
from jax.experimental import pallas as pl
from jax.experimental.pallas import tpu as pltpu


# Raw (PyTorch) layer sizes and padded (lane-aligned) kernel sizes, (in, out).
RAW_SIZES = [(784, 600), (600, 500), (500, 250), (250, 10)]
PAD_SIZES = [(784, 640), (640, 512), (512, 256), (256, 128)]
IN_FEATURES = 784      # kept unpadded (full-array last dim in the BlockSpec)
N_OUT = 128            # 10 padded to a full lane (unmasked vst)
SMALL_BATCH_MAX = 256  # single grid step up to this many rows
MAX_BLOCK_M = 512      # rows per grid step for large batches (128/256-aligned)


def _detect_bf16_epilogue():
    """bf16 bias+ReLU epilogue only on chips with a bf16 VPU (v6e / v7x)."""
    try:
        kind = jax.devices()[0].device_kind.lower()
    except Exception:  # pragma: no cover - conservative default
        return False
    return ("v6" in kind) or ("v7" in kind) or ("7x" in kind)


_EPI_DTYPE = jnp.bfloat16 if _detect_bf16_epilogue() else jnp.float32


def _round_up(x, m):
    return -(-x // m) * m


def _fnet_kernel(x_ref,
                 w1_ref, b1_ref, w2_ref, b2_ref,
                 w3_ref, b3_ref, w4_ref, b4_ref,
                 o_ref):
    def layer(h, w_ref, b_ref, relu):
        # bf16 x bf16 -> f32 MXU accumulation.
        acc = jnp.dot(h, w_ref[...], preferred_element_type=jnp.float32)
        # Bias + (optional) ReLU in the bias dtype (bf16 on v6e/v7x, f32 on v5e;
        # final layer's bias is always f32).
        acc = acc.astype(b_ref.dtype) + b_ref[...]
        if relu:
            acc = jnp.maximum(acc, 0).astype(jnp.bfloat16)  # feed next MXU pass
        return acc

    h = layer(x_ref[...], w1_ref, b1_ref, relu=True)
    h = layer(h, w2_ref, b2_ref, relu=True)
    h = layer(h, w3_ref, b3_ref, relu=True)
    o_ref[...] = layer(h, w4_ref, b4_ref, relu=False).astype(o_ref.dtype)


def init_params(key):
    """nn.Linear-style init (weights stored transposed as (in, out)), f32."""
    params = []
    for i, (fan_in, fan_out) in enumerate(RAW_SIZES):
        kw, kb, key = jax.random.split(jax.random.fold_in(key, i), 3)
        bound = 1.0 / jnp.sqrt(fan_in)
        w = jax.random.uniform(kw, (fan_in, fan_out), jnp.float32, -bound, bound)
        b = jax.random.uniform(kb, (fan_out,), jnp.float32, -bound, bound)
        params.append((w, b))
    return params


def prepare_params(params):
    """Zero-pad to lane-aligned shapes; weights -> bf16, biases -> (1, N)."""
    padded = []
    last = len(params) - 1
    for li, ((w, b), (kp, npad)) in enumerate(zip(params, PAD_SIZES)):
        k, n = w.shape
        w_p = jnp.zeros((kp, npad), jnp.bfloat16).at[:k, :n].set(
            w.astype(jnp.bfloat16))
        b_dtype = jnp.float32 if li == last else _EPI_DTYPE
        b_p = jnp.zeros((1, npad), b_dtype).at[0, :n].set(b.astype(b_dtype))
        padded.append((w_p, b_p))
    return tuple(padded)


def fnet_forward(x, padded_params):
    """Fused 4-layer forward. x: any shape flattening to (-1, 784)."""
    x2 = x.reshape(-1, 784)
    B = x2.shape[0]

    if B <= SMALL_BATCH_MAX:
        # Single grid step; round to 16 rows (native bf16 sublane tile).
        block_m = _round_up(max(B, 1), 16)
    else:
        # >=2 grid steps so both v7x TensorCores get work; 128-aligned tiles
        # capped at MAX_BLOCK_M to amortize per-step overhead.
        block_m = min(MAX_BLOCK_M, _round_up(-(-B // 2), 128))
    b_pad = _round_up(B, block_m)

    xb = x2.astype(jnp.bfloat16)
    if b_pad != B:
        xb = jnp.pad(xb, ((0, b_pad - B), (0, 0)))

    (w1, b1), (w2, b2), (w3, b3), (w4, b4) = padded_params

    def wspec(a):
        # Constant block index: weights/biases are DMA'd once and stay
        # VMEM-resident across all batch tiles.
        return pl.BlockSpec(a.shape, lambda i: (0, 0))

    out = pl.pallas_call(
        _fnet_kernel,
        out_shape=jax.ShapeDtypeStruct((b_pad, N_OUT), jnp.float32),
        grid=(b_pad // block_m,),
        in_specs=[
            pl.BlockSpec((block_m, IN_FEATURES), lambda i: (i, 0)),
            wspec(w1), wspec(b1),
            wspec(w2), wspec(b2),
            wspec(w3), wspec(b3),
            wspec(w4), wspec(b4),
        ],
        out_specs=pl.BlockSpec((block_m, N_OUT), lambda i: (i, 0)),
        compiler_params=pltpu.CompilerParams(
            dimension_semantics=("parallel",)),
    )(xb, w1, b1, w2, b2, w3, b3, w4, b4)

    return out[:B, :10]


def fnet_reference(x, params):
    """Pure-JAX reference mirroring the kernel's mixed precision."""
    h = x.reshape(-1, 784).astype(jnp.bfloat16)
    last = len(params) - 1
    for li, (w, b) in enumerate(params):
        acc = jnp.dot(h, w.astype(jnp.bfloat16),
                      preferred_element_type=jnp.float32)
        b_dtype = jnp.float32 if li == last else _EPI_DTYPE
        acc = acc.astype(b_dtype) + b.astype(b_dtype)
        if li < last:
            h = jnp.maximum(acc, 0).astype(jnp.bfloat16)
        else:
            h = acc.astype(jnp.float32)
    return h


if __name__ == "__main__":
    key = jax.random.PRNGKey(0)
    pkey, xkey = jax.random.split(key)
    params = init_params(pkey)
    padded_params = prepare_params(params)

    # MNIST-like input: batch=8, 1x28x28 images (784 features after flatten).
    x = jax.random.normal(xkey, (8, 1, 28, 28), jnp.float32)

    fwd = jax.jit(fnet_forward)
    out = jax.block_until_ready(fwd(x, padded_params))

    ref = fnet_reference(x, params)
    assert out.shape == (8, 10), out.shape
    max_err = float(jnp.max(jnp.abs(out - ref)))
    assert jnp.allclose(out, ref, atol=2e-2, rtol=2e-2), max_err
    print("KERNEL_OK")
</pallas_src>

<mosaic_0001>
module attributes {stable_mosaic.version = 11 : i64} {
  func.func @_fnet_kernel(%arg0: i32, %arg1: memref<16x784xbf16, #tpu.memory_space<vmem>>, %arg2: memref<784x640xbf16, #tpu.memory_space<vmem>>, %arg3: memref<1x640xf32, #tpu.memory_space<vmem>>, %arg4: memref<640x512xbf16, #tpu.memory_space<vmem>>, %arg5: memref<1x512xf32, #tpu.memory_space<vmem>>, %arg6: memref<512x256xbf16, #tpu.memory_space<vmem>>, %arg7: memref<1x256xf32, #tpu.memory_space<vmem>>, %arg8: memref<256x128xbf16, #tpu.memory_space<vmem>>, %arg9: memref<1x128xf32, #tpu.memory_space<vmem>>, %arg10: memref<16x128xf32, #tpu.memory_space<vmem>>) attributes {dimension_semantics = [#tpu.dimension_semantics<parallel>], iteration_bounds = array<i64: 1>, scalar_prefetch = 0 : i64, scratch_operands = 0 : i64, tpu.core_type = #tpu.core_type<tc>, window_params = [{transform_indices = @transform_0, window_bounds = array<i64: 16, 784>}, {pipeline_mode = #tpu.pipeline_mode<synchronous>, transform_indices = @transform_1, window_bounds = array<i64: 784, 640>}, {pipeline_mode = #tpu.pipeline_mode<synchronous>, transform_indices = @transform_2, window_bounds = array<i64: 1, 640>}, {pipeline_mode = #tpu.pipeline_mode<synchronous>, transform_indices = @transform_3, window_bounds = array<i64: 640, 512>}, {pipeline_mode = #tpu.pipeline_mode<synchronous>, transform_indices = @transform_4, window_bounds = array<i64: 1, 512>}, {pipeline_mode = #tpu.pipeline_mode<synchronous>, transform_indices = @transform_5, window_bounds = array<i64: 512, 256>}, {pipeline_mode = #tpu.pipeline_mode<synchronous>, transform_indices = @transform_6, window_bounds = array<i64: 1, 256>}, {pipeline_mode = #tpu.pipeline_mode<synchronous>, transform_indices = @transform_7, window_bounds = array<i64: 256, 128>}, {pipeline_mode = #tpu.pipeline_mode<synchronous>, transform_indices = @transform_8, window_bounds = array<i64: 1, 128>}, {transform_indices = @transform_9, window_bounds = array<i64: 16, 128>}]} {
    %c0 = arith.constant 0 : index
    %c0_0 = arith.constant 0 : index
    %0 = vector.load %arg1[%c0, %c0_0] : memref<16x784xbf16, #tpu.memory_space<vmem>>, vector<16x784xbf16>
    %c0_1 = arith.constant 0 : index
    %c0_2 = arith.constant 0 : index
    %1 = vector.load %arg2[%c0_1, %c0_2] : memref<784x640xbf16, #tpu.memory_space<vmem>>, vector<784x640xbf16>
    %cst = arith.constant dense<0.000000e+00> : vector<16x640xf32>
    %2 = tpu.matmul %0, %1, %cst {dimension_numbers = #tpu.dot_dimension_numbers<[1], [0], [0], [1], [0, 0, 1, 1], [], []>} : vector<16x784xbf16>, vector<784x640xbf16>, vector<16x640xf32> -> vector<16x640xf32>
    %c0_3 = arith.constant 0 : index
    %c0_4 = arith.constant 0 : index
    %3 = vector.load %arg3[%c0_3, %c0_4] : memref<1x640xf32, #tpu.memory_space<vmem>>, vector<1x640xf32>
    %4 = vector.broadcast %3 : vector<1x640xf32> to vector<16x640xf32>
    %5 = arith.addf %2, %4 : vector<16x640xf32>
    %cst_5 = arith.constant 0.000000e+00 : f32
    %6 = vector.broadcast %cst_5 : f32 to vector<16x640xf32>
    %7 = arith.maximumf %5, %6 : vector<16x640xf32>
    %8 = arith.truncf %7 : vector<16x640xf32> to vector<16x640xbf16>
    %c0_6 = arith.constant 0 : index
    %c0_7 = arith.constant 0 : index
    %9 = vector.load %arg4[%c0_6, %c0_7] : memref<640x512xbf16, #tpu.memory_space<vmem>>, vector<640x512xbf16>
    %cst_8 = arith.constant dense<0.000000e+00> : vector<16x512xf32>
    %10 = tpu.matmul %8, %9, %cst_8 {dimension_numbers = #tpu.dot_dimension_numbers<[1], [0], [0], [1], [0, 0, 1, 1], [], []>} : vector<16x640xbf16>, vector<640x512xbf16>, vector<16x512xf32> -> vector<16x512xf32>
    %c0_9 = arith.constant 0 : index
    %c0_10 = arith.constant 0 : index
    %11 = vector.load %arg5[%c0_9, %c0_10] : memref<1x512xf32, #tpu.memory_space<vmem>>, vector<1x512xf32>
    %12 = vector.broadcast %11 : vector<1x512xf32> to vector<16x512xf32>
    %13 = arith.addf %10, %12 : vector<16x512xf32>
    %cst_11 = arith.constant 0.000000e+00 : f32
    %14 = vector.broadcast %cst_11 : f32 to vector<16x512xf32>
    %15 = arith.maximumf %13, %14 : vector<16x512xf32>
    %16 = arith.truncf %15 : vector<16x512xf32> to vector<16x512xbf16>
    %c0_12 = arith.constant 0 : index
    %c0_13 = arith.constant 0 : index
    %17 = vector.load %arg6[%c0_12, %c0_13] : memref<512x256xbf16, #tpu.memory_space<vmem>>, vector<512x256xbf16>
    %cst_14 = arith.constant dense<0.000000e+00> : vector<16x256xf32>
    %18 = tpu.matmul %16, %17, %cst_14 {dimension_numbers = #tpu.dot_dimension_numbers<[1], [0], [0], [1], [0, 0, 1, 1], [], []>} : vector<16x512xbf16>, vector<512x256xbf16>, vector<16x256xf32> -> vector<16x256xf32>
    %c0_15 = arith.constant 0 : index
    %c0_16 = arith.constant 0 : index
    %19 = vector.load %arg7[%c0_15, %c0_16] : memref<1x256xf32, #tpu.memory_space<vmem>>, vector<1x256xf32>
    %20 = vector.broadcast %19 : vector<1x256xf32> to vector<16x256xf32>
    %21 = arith.addf %18, %20 : vector<16x256xf32>
    %cst_17 = arith.constant 0.000000e+00 : f32
    %22 = vector.broadcast %cst_17 : f32 to vector<16x256xf32>
    %23 = arith.maximumf %21, %22 : vector<16x256xf32>
    %24 = arith.truncf %23 : vector<16x256xf32> to vector<16x256xbf16>
    %c0_18 = arith.constant 0 : index
    %c0_19 = arith.constant 0 : index
    %25 = vector.load %arg8[%c0_18, %c0_19] : memref<256x128xbf16, #tpu.memory_space<vmem>>, vector<256x128xbf16>
    %cst_20 = arith.constant dense<0.000000e+00> : vector<16x128xf32>
    %26 = tpu.matmul %24, %25, %cst_20 {dimension_numbers = #tpu.dot_dimension_numbers<[1], [0], [0], [1], [0, 0, 1, 1], [], []>} : vector<16x256xbf16>, vector<256x128xbf16>, vector<16x128xf32> -> vector<16x128xf32>
    %c0_21 = arith.constant 0 : index
    %c0_22 = arith.constant 0 : index
    %27 = vector.load %arg9[%c0_21, %c0_22] : memref<1x128xf32, #tpu.memory_space<vmem>>, vector<1x128xf32>
    %28 = vector.broadcast %27 : vector<1x128xf32> to vector<16x128xf32>
    %29 = arith.addf %26, %28 : vector<16x128xf32>
    %c0_23 = arith.constant 0 : index
    %c0_24 = arith.constant 0 : index
    %30 = vector.load %arg10[%c0_23, %c0_24] : memref<16x128xf32, #tpu.memory_space<vmem>>, vector<16x128xf32>
    tpu.vector_store %arg10[%c0_23, %c0_24], %29 {strides = array<i32>} : memref<16x128xf32, #tpu.memory_space<vmem>>, vector<16x128xf32>,
    return
  }
  func.func @transform_0(%arg0: i32) -> (i32, i32) {
    %c0_i32 = arith.constant 0 : i32
    %c0_i32_0 = arith.constant 0 : i32
    return %arg0, %c0_i32 : i32, i32
  }
  func.func @transform_1(%arg0: i32) -> (i32, i32) {
    %c0_i32 = arith.constant 0 : i32
    %c0_i32_0 = arith.constant 0 : i32
    %c0_i32_1 = arith.constant 0 : i32
    return %c0_i32, %c0_i32_0 : i32, i32
  }
  func.func @transform_2(%arg0: i32) -> (i32, i32) {
    %c0_i32 = arith.constant 0 : i32
    %c0_i32_0 = arith.constant 0 : i32
    %c0_i32_1 = arith.constant 0 : i32
    return %c0_i32, %c0_i32_0 : i32, i32
  }
  func.func @transform_3(%arg0: i32) -> (i32, i32) {
    %c0_i32 = arith.constant 0 : i32
    %c0_i32_0 = arith.constant 0 : i32
    %c0_i32_1 = arith.constant 0 : i32
    return %c0_i32, %c0_i32_0 : i32, i32
  }
  func.func @transform_4(%arg0: i32) -> (i32, i32) {
    %c0_i32 = arith.constant 0 : i32
    %c0_i32_0 = arith.constant 0 : i32
    %c0_i32_1 = arith.constant 0 : i32
    return %c0_i32, %c0_i32_0 : i32, i32
  }
  func.func @transform_5(%arg0: i32) -> (i32, i32) {
    %c0_i32 = arith.constant 0 : i32
    %c0_i32_0 = arith.constant 0 : i32
    %c0_i32_1 = arith.constant 0 : i32
    return %c0_i32, %c0_i32_0 : i32, i32
  }
  func.func @transform_6(%arg0: i32) -> (i32, i32) {
    %c0_i32 = arith.constant 0 : i32
    %c0_i32_0 = arith.constant 0 : i32
    %c0_i32_1 = arith.constant 0 : i32
    return %c0_i32, %c0_i32_0 : i32, i32
  }
  func.func @transform_7(%arg0: i32) -> (i32, i32) {
    %c0_i32 = arith.constant 0 : i32
    %c0_i32_0 = arith.constant 0 : i32
    %c0_i32_1 = arith.constant 0 : i32
    return %c0_i32, %c0_i32_0 : i32, i32
  }
  func.func @transform_8(%arg0: i32) -> (i32, i32) {
    %c0_i32 = arith.constant 0 : i32
    %c0_i32_0 = arith.constant 0 : i32
    %c0_i32_1 = arith.constant 0 : i32
    return %c0_i32, %c0_i32_0 : i32, i32
  }
  func.func @transform_9(%arg0: i32) -> (i32, i32) {
    %c0_i32 = arith.constant 0 : i32
    %c0_i32_0 = arith.constant 0 : i32
    return %arg0, %c0_i32 : i32, i32
  }
}

</mosaic_0001>

<bundles_post_ra>
// kernel: fnet_forward.1
= control target key start
LH: loop header
LB: loop body
LE: loop exit
PB: predicated region body
PF: predicated region fallthrough
CT: control target
= control target key end

     0   :  { %14 = vsyncpa [#allocation3], 0  ;;  %s5953_s0 = inlined_call_operand.vmem [shape: bf16[16,784], index: 0, kind: input, shape index: {}]   ;;  %s5954_s1 = inlined_call_operand.hbm [shape: bf16[784,640], index: 1, kind: input, shape index: {}]   ;;  %s5955_s2 = inlined_call_operand.vmem [shape: f32[1,640], index: 2, kind: input, shape index: {}]   ;;  %s5956_s3 = inlined_call_operand.hbm [shape: bf16[640,512], index: 3, kind: input, shape index: {}]   ;;  %s5957_s4 = inlined_call_operand.vmem [shape: f32[1,512], index: 4, kind: input, shape index: {}]   ;;  %s5958_s5 = inlined_call_operand.vmem [shape: bf16[512,256], index: 5, kind: input, shape index: {}]   ;;  %s5959_s6 = inlined_call_operand.vmem [shape: f32[1,256], index: 6, kind: input, shape index: {}]   ;;  %s5960_s7 = inlined_call_operand.hbm [shape: bf16[256,128], index: 7, kind: input, shape index: {}]   ;;  %s5961_s8 = inlined_call_operand.vmem [shape: f32[1,128], index: 8, kind: input, shape index: {}]   ;;  %s5962_s9 = inlined_call_operand.vmem [shape: f32[16,128], index: 9, kind: output, shape index: {}]  }
   0x1   :  { %15 = vsyncpa [#allocation5], 0  ;;  %s5543_s30 = smov [#allocation4]  }
   0x2   :  { %s37_s10 = sshll.u32 %s5543_s30, 4  ;;  %s38_s10 = int_to_ptr.vmem [resolvable:$true] %s37_s10 }
   0x3   :  { %s5487_s11 = scalar_lea.vmem %s38_s10, 20480  ;;  %p5492_p1 = scmp.lt.s32.totalorder %s38_s10, %s38_s10 }
   0x4   :  { %p5488_p0 = scmp.ne.s32.totalorder %s38_s10, %s5487_s11  ;;  %p5493_p2 = scmp.lt.s32.totalorder %s5487_s11, %s5487_s11 }
   0x6   :  { %p5494_p3 = por %p5493_p2, %p5492_p1 }
   0x8   :  { %p5495_p4 = pnand %p5494_p3, %p5488_p0 }
   0xa   :  { %5498 = shalt.err (!%p5495_p4)
}
   0xb   :  { %s5544_s12 = smov 256   ;;  %s5545_s13 = smov 16  }
   0xc   :  { %43 = dma.hbm_to_vmem [thread:$0]  %s5956_s3, 20480, %s38_s10, [#allocation5], %s5544_s12, %s5544_s12, %s5545_s13  }
   0xd   :  { %s5546_s16 = smov [#allocation2]  }
   0xe   :  { %s23_s17 = sshll.u32 %s5546_s16, 4  ;;  %s24_s17 = int_to_ptr.vmem [resolvable:$true] %s23_s17 }
   0xf   :  { %s5507_s18 = scalar_lea.vmem %s24_s17, 31360  ;;  %p5512_p6 = scmp.lt.s32.totalorder %s24_s17, %s24_s17 }
  0x10   :  { %p5508_p5 = scmp.ne.s32.totalorder %s24_s17, %s5507_s18  ;;  %p5513_p7 = scmp.lt.s32.totalorder %s5507_s18, %s5507_s18 }
  0x12   :  { %p5514_p8 = por %p5513_p7, %p5512_p6 }
  0x14   :  { %p5515_p9 = pnand %p5514_p8, %p5508_p5 }
  0x16   :  { %5518 = shalt.err (!%p5515_p9)
}
  0x17   :  { %s5547_s19 = smov 320   ;;  %s5548_s20 = smov 20  }
  0x18   :  { %29 = dma.hbm_to_vmem [thread:$0]  %s5954_s1, 31360, %s24_s17, [#allocation3], %s5547_s19, %s5547_s19, %s5548_s20  }
  0x19   :  { %s5549_s23 = smov [#allocation6]  }
  0x1a   :  { %s55_s24 = sshll.u32 %s5549_s23, 4  ;;  %s56_s24 = int_to_ptr.vmem [resolvable:$true] %s55_s24 }
  0x1b   :  { %s5527_s3 = scalar_lea.vmem %s56_s24, 2048  ;;  %p5532_p11 = scmp.lt.s32.totalorder %s56_s24, %s56_s24 }
  0x1c   :  { %p5528_p10 = scmp.ne.s32.totalorder %s56_s24, %s5527_s3  ;;  %p5533_p12 = scmp.lt.s32.totalorder %s5527_s3, %s5527_s3 }
  0x1e   :  { %p5534_p13 = por %p5533_p12, %p5532_p11 }
  0x20   :  { %p5535_p0 = pnand %p5534_p13, %p5528_p10 }
  0x22   :  { %5538 = shalt.err (!%p5535_p0)
}
  0x23   :  { %s5550_s25 = smov 64   ;;  %s5551_s26 = smov 4  }
  0x24   :  { %61 = dma.hbm_to_vmem [thread:$0]  %s5960_s7, 2048, %s56_s24, [#allocation5], %s5550_s25, %s5550_s25, %s5551_s26  }
  0x25   :  { %5539 = dma.done.wait [#allocation3], 31360  }
  0x26   :  { %5540 = vsyncadd [#allocation3], 4294935936 }
  0x27   :  { %5541 = dma.done.wait [#allocation5], 22528  }
  0x28   :  { %5542 = vsyncadd [#allocation5], 4294944768  ;;  %v4767_v0 = vld [vmem:[#allocation2 + $0x11c] ss:$20 sps:$4 sm:$0xff]   ;;  %v4771_v2 = vld [vmem:[#allocation2 + $0x118] ss:$20 sps:$4 sm:$0xff]  }
  0x29   :  { %v4769_v1 = vld [vmem:[#allocation2 + $0x39c] ss:$20 sps:$4 sm:$0xff]   ;;  %1716 = vmatprep.subr.bf16.mxu0 %v4767_v0  ;;  %v4772_v3 = vld [vmem:[#allocation2 + $0x398] ss:$20 sps:$4 sm:$0xff]   ;;  %v4773_v4 = vld [vmem:[#allocation2 + $0xf4] ss:$20 sps:$4 sm:$0xff]  }
  0x2a   :  { %1759 = vmatprep.subr.bf16.mxu1 %v4769_v1  ;;  %1717 = vmatpush1.bf16.msra.mxu0 %v4771_v2  ;;  %v4775_v5 = vld [vmem:[#allocation2 + $0x374] ss:$20 sps:$4 sm:$0xff]   ;;  %v4777_v6 = vld [vmem:[#allocation2 + $0xf0] ss:$20 sps:$4 sm:$0xff]   ;;  %v4779_v8 = vld [vmem:[#allocation2 + $0xcc] ss:$20 sps:$4 sm:$0xff]  }
  0x2b   :  { %1760 = vmatpush1.bf16.msra.mxu1 %v4772_v3  ;;  %1718 = vmatprep.subr.bf16.mxu0 %v4773_v4  ;;  %v4778_v7 = vld [vmem:[#allocation2 + $0x370] ss:$20 sps:$4 sm:$0xff]   ;;  %v4781_v9 = vld [vmem:[#allocation2 + $0x34c] ss:$20 sps:$4 sm:$0xff]   ;;  %v4783_v10 = vld [vmem:[#allocation2 + $0xc8] ss:$20 sps:$4 sm:$0xff]  }
  0x2c   :  { %1761 = vmatprep.subr.bf16.mxu1 %v4775_v5  ;;  %v4784_v11 = vld [vmem:[#allocation2 + $0x348] ss:$20 sps:$4 sm:$0xff]   ;;  %v4785_v12 = vld [vmem:[#allocation2 + $0xa4] ss:$20 sps:$4 sm:$0xff]   ;;  %v4789_v14 = vld [vmem:[#allocation2 + $0xa0] ss:$20 sps:$4 sm:$0xff]  }
  0x2d   :  { %v4787_v13 = vld [vmem:[#allocation2 + $0x324] ss:$20 sps:$4 sm:$0xff]   ;;  %v4790_v15 = vld [vmem:[#allocation2 + $0x320] ss:$20 sps:$4 sm:$0xff]   ;;  %v4791_v16 = vld [vmem:[#allocation2 + $0x7c] ss:$20 sps:$4 sm:$0xff]  }
  0x2e   :  { %1719 = vmatpush1.bf16.msra.mxu0 %v4777_v6  ;;  %v4793_v17 = vld [vmem:[#allocation2 + $0x2fc] ss:$20 sps:$4 sm:$0xff]   ;;  %v4795_v18 = vld [vmem:[#allocation2 + $0x78] ss:$20 sps:$4 sm:$0xff]   ;;  %v4797_v20 = vld [vmem:[#allocation2 + $0x54] ss:$20 sps:$4 sm:$0xff]  }
  0x2f   :  { %1762 = vmatpush1.bf16.msra.mxu1 %v4778_v7  ;;  %1720 = vmatprep.subr.bf16.mxu0 %v4779_v8  ;;  %v4796_v19 = vld [vmem:[#allocation2 + $0x2f8] ss:$20 sps:$4 sm:$0xff]   ;;  %v4799_v21 = vld [vmem:[#allocation2 + $0x2d4] ss:$20 sps:$4 sm:$0xff]   ;;  %v4801_v22 = vld [vmem:[#allocation2 + $0x50] ss:$20 sps:$4 sm:$0xff]  }
  0x30   :  { %1763 = vmatprep.subr.bf16.mxu1 %v4781_v9  ;;  %v4802_v23 = vld [vmem:[#allocation2 + $0x2d0] ss:$20 sps:$4 sm:$0xff]   ;;  %v4803_v24 = vld [vmem:[#allocation2 + $0x2c] ss:$20 sps:$4 sm:$0xff]   ;;  %v4807_v26 = vld [vmem:[#allocation2 + $0x28] ss:$20 sps:$4 sm:$0xff]  }
  0x31   :  { %v4805_v25 = vld [vmem:[#allocation2 + $0x2ac] ss:$20 sps:$4 sm:$0xff]   ;;  %v4808_v27 = vld [vmem:[#allocation2 + $0x2a8] ss:$20 sps:$4 sm:$0xff]   ;;  %v4809_v28 = vld [vmem:[#allocation2 + $0x4] ss:$20 sps:$4 sm:$0xff]  }
  0x32   :  { %1721 = vmatpush1.bf16.msra.mxu0 %v4783_v10  ;;  %v4811_v29 = vld [vmem:[#allocation2 + $0x284] ss:$20 sps:$4 sm:$0xff]   ;;  %v4813_v30 = vld [vmem:[#allocation2] ss:$20 sps:$4 sm:$0xff]   ;;  %v4815_v32 = vld [vmem:[#allocation2 + $0x25c] ss:$20 sps:$4 sm:$0xff]  }
  0x33   :  { %1764 = vmatpush1.bf16.msra.mxu1 %v4784_v11  ;;  %1722 = vmatprep.subr.bf16.mxu0 %v4785_v12  ;;  %v4814_v31 = vld [vmem:[#allocation2 + $0x280] ss:$20 sps:$4 sm:$0xff]   ;;  %v4817_v33 = vld [vmem:[#allocation2 + $0x4dc] ss:$20 sps:$4 sm:$0xff]   ;;  %v4819_v34 = vld [vmem:[#allocation2 + $0x258] ss:$20 sps:$4 sm:$0xff]  }
  0x34   :  { %1765 = vmatprep.subr.bf16.mxu1 %v4787_v13  ;;  %v4820_v35 = vld [vmem:[#allocation2 + $0x4d8] ss:$20 sps:$4 sm:$0xff]   ;;  %v4821_v36 = vld [vmem:[#allocation2 + $0x234] ss:$20 sps:$4 sm:$0xff]   ;;  %v4825_v38 = vld [vmem:[#allocation2 + $0x230] ss:$20 sps:$4 sm:$0xff]  }
  0x35   :  { %v4823_v37 = vld [vmem:[#allocation2 + $0x4b4] ss:$20 sps:$4 sm:$0xff]   ;;  %v4826_v39 = vld [vmem:[#allocation2 + $0x4b0] ss:$20 sps:$4 sm:$0xff]   ;;  %v4827_v40 = vld [vmem:[#allocation2 + $0x20c] ss:$20 sps:$4 sm:$0xff]  }
  0x36   :  { %1723 = vmatpush1.bf16.msra.mxu0 %v4789_v14  ;;  %v4829_v41 = vld [vmem:[#allocation2 + $0x48c] ss:$20 sps:$4 sm:$0xff]   ;;  %v4831_v42 = vld [vmem:[#allocation2 + $0x208] ss:$20 sps:$4 sm:$0xff]   ;;  %v4833_v44 = vld [vmem:[#allocation2 + $0x1e4] ss:$20 sps:$4 sm:$0xff]  }
  0x37   :  { %1766 = vmatpush1.bf16.msra.mxu1 %v4790_v15  ;;  %1724 = vmatprep.subr.bf16.mxu0 %v4791_v16  ;;  %v4832_v43 = vld [vmem:[#allocation2 + $0x488] ss:$20 sps:$4 sm:$0xff]   ;;  %v4835_v45 = vld [vmem:[#allocation2 + $0x464] ss:$20 sps:$4 sm:$0xff]   ;;  %v4837_v46 = vld [vmem:[#allocation2 + $0x1e0] ss:$20 sps:$4 sm:$0xff]  }
  0x38   :  { %1767 = vmatprep.subr.bf16.mxu1 %v4793_v17  ;;  %v4838_v47 = vld [vmem:[#allocation2 + $0x460] ss:$20 sps:$4 sm:$0xff]   ;;  %v4839_v49 = vld [vmem:[#allocation2 + $0x1bc] ss:$20 sps:$4 sm:$0xff]   ;;  %v5622_v50 = vld [vmem:[%s5953_s0 + $0xc] ss:$28 sps:$4 sm:$0xff]  }
  0x39   :  { %v5617_v48 = vld [vmem:[%s5953_s0 + $0x4] ss:$28 sps:$4 sm:$0xff]   ;;  %v4841_v51 = vld [vmem:[#allocation2 + $0x43c] ss:$20 sps:$4 sm:$0xff]   ;;  %1791 = vmatprep.mubr.bf16.mxu1 %v5622_v50  ;;  %v4843_v52 = vld [vmem:[#allocation2 + $0x1b8] ss:$20 sps:$4 sm:$0xff]  }
  0x3a   :  { %1725 = vmatpush1.bf16.msra.mxu0 %v4795_v18  ;;  %1748 = vmatprep.mubr.bf16.mxu0 %v5617_v48  ;;  %v4844_v53 = vld [vmem:[#allocation2 + $0x438] ss:$20 sps:$4 sm:$0xff]   ;;  %v4845_v54 = vld [vmem:[#allocation2 + $0x194] ss:$20 sps:$4 sm:$0xff]   ;;  %v4849_v56 = vld [vmem:[#allocation2 + $0x190] ss:$20 sps:$4 sm:$0xff]  }
  0x3b   :  { %1768 = vmatpush1.bf16.msra.mxu1 %v4796_v19  ;;  %1726 = vmatprep.subr.bf16.mxu0 %v4797_v20  ;;  %v4847_v55 = vld [vmem:[#allocation2 + $0x414] ss:$20 sps:$4 sm:$0xff]   ;;  %v4850_v57 = vld [vmem:[#allocation2 + $0x410] ss:$20 sps:$4 sm:$0xff]   ;;  %v4851_v58 = vld [vmem:[#allocation2 + $0x16c] ss:$20 sps:$4 sm:$0xff]  }
  0x3c   :  { %1769 = vmatprep.subr.bf16.mxu1 %v4799_v21  ;;  %v4853_v59 = vld [vmem:[#allocation2 + $0x3ec] ss:$20 sps:$4 sm:$0xff]   ;;  %v4855_v60 = vld [vmem:[#allocation2 + $0x168] ss:$20 sps:$4 sm:$0xff]   ;;  %v4857_v62 = vld [vmem:[#allocation2 + $0x144] ss:$20 sps:$4 sm:$0xff]  }
  0x3d   :  { %v4856_v61 = vld [vmem:[#allocation2 + $0x3e8] ss:$20 sps:$4 sm:$0xff]   ;;  %v4859_v63 = vld [vmem:[#allocation2 + $0x3c4] ss:$20 sps:$4 sm:$0xff]   ;;  %v4861_v0 = vld [vmem:[#allocation2 + $0x140] ss:$20 sps:$4 sm:$0xff]  }
  0x3e   :  { %1727 = vmatpush1.bf16.msra.mxu0 %v4801_v22  ;;  %v4862_v1 = vld [vmem:[#allocation2 + $0x3c0] ss:$20 sps:$4 sm:$0xff]   ;;  %v4871_v2 = vld [vmem:[#allocation2 + $0x61c] ss:$20 sps:$4 sm:$0xff]   ;;  %v4874_v3 = vld [vmem:[#allocation2 + $0x784] ss:$20 sps:$4 sm:$0xff]  }
  0x3f   :  { %1770 = vmatpush1.bf16.msra.mxu1 %v4802_v23  ;;  %1728 = vmatprep.subr.bf16.mxu0 %v4803_v24  ;;  %v5629_v4 = vld [vmem:[%s5953_s0] ss:$28 sps:$4 sm:$0xff]   ;;  %v5634_v5 = vld [vmem:[%s5953_s0 + $0x8] ss:$28 sps:$4 sm:$0xff]   ;;  %v4869_v6 = vld [vmem:[#allocation2 + $0x618] ss:$20 sps:$4 sm:$0xff]  }
  0x40   :  { %1771 = vmatprep.subr.bf16.mxu1 %v4805_v25  ;;  %v4872_v7 = vld [vmem:[#allocation2 + $0x780] ss:$20 sps:$4 sm:$0xff]   ;;  %v4880_v9 = vld [vmem:[#allocation2 + $0x124] ss:$20 sps:$4 sm:$0xff]   ;;  %v5552_v11 = vmov 0   ;;  %vm1712_vm0 = vcmask 130048  }
  0x41   :  { %v4877_v8 = vld [vmem:[#allocation2 + $0x5f4] ss:$20 sps:$4 sm:$0xff]   ;;  %v4875_v10 = vld [vmem:[#allocation2 + $0x5f0] ss:$20 sps:$4 sm:$0xff]   ;;  %v4883_v12 = vld [vmem:[#allocation2 + $0x5cc] ss:$20 sps:$4 sm:$0xff]  }
  0x42   :  { %1729 = vmatpush1.bf16.msra.mxu0 %v4807_v26  ;;  %v4878_v13 = vld [vmem:[#allocation2 + $0x120] ss:$20 sps:$4 sm:$0xff]   ;;  %v4881_v15 = vld [vmem:[#allocation2 + $0x5c8] ss:$20 sps:$4 sm:$0xff]   ;;  %v4890_v17 = vld [vmem:[#allocation2 + $0x5a4] ss:$20 sps:$4 sm:$0xff]  }
  0x43   :  { %1772 = vmatpush1.bf16.msra.mxu1 %v4808_v27  ;;  %1730 = vmatprep.subr.bf16.mxu0 %v4809_v28  ;;  %v5642_v14 = vld [vmem:[%s5953_s0 + $0x18] ss:$28 sps:$4 sm:$0xff]   ;;  %v4887_v16 = vld [vmem:[#allocation2 + $0xfc] ss:$20 sps:$4 sm:$0xff]   ;;  %v4899_v24 = vld [vmem:[#allocation2 + $0xac] ss:$20 sps:$4 sm:$0xff]  }
  0x44   :  { %1773 = vmatprep.subr.bf16.mxu1 %v4811_v29  ;;  %v4885_v18 = vld [vmem:[#allocation2 + $0xf8] ss:$20 sps:$4 sm:$0xff]   ;;  %v4888_v19 = vld [vmem:[#allocation2 + $0x5a0] ss:$20 sps:$4 sm:$0xff]   ;;  %v4896_v21 = vld [vmem:[#allocation2 + $0x57c] ss:$20 sps:$4 sm:$0xff]  }
  0x45   :  { %v4893_v20 = vld [vmem:[#allocation2 + $0xd4] ss:$20 sps:$4 sm:$0xff]   ;;  %v4891_v22 = vld [vmem:[#allocation2 + $0xd0] ss:$20 sps:$4 sm:$0xff]   ;;  %v4894_v23 = vld [vmem:[#allocation2 + $0x578] ss:$20 sps:$4 sm:$0xff]  }
  0x46   :  { %1731 = vmatpush1.bf16.msra.mxu0 %v4813_v30  ;;  %v4902_v25 = vld [vmem:[#allocation2 + $0x554] ss:$20 sps:$4 sm:$0xff]   ;;  %v4900_v27 = vld [vmem:[#allocation2 + $0x550] ss:$20 sps:$4 sm:$0xff]   ;;  %v4908_v29 = vld [vmem:[#allocation2 + $0x52c] ss:$20 sps:$4 sm:$0xff]  }
  0x47   :  { %1774 = vmatpush1.bf16.msra.mxu1 %v4814_v31  ;;  %1732 = vmatprep.subr.bf16.mxu0 %v4815_v32  ;;  %v4897_v26 = vld [vmem:[#allocation2 + $0xa8] ss:$20 sps:$4 sm:$0xff]   ;;  %v4905_v28 = vld [vmem:[#allocation2 + $0x84] ss:$20 sps:$4 sm:$0xff]   ;;  %v4903_v30 = vld [vmem:[#allocation2 + $0x80] ss:$20 sps:$4 sm:$0xff]  }
  0x48   :  { %1775 = vmatprep.subr.bf16.mxu1 %v4817_v33  ;;  %v4906_v31 = vld [vmem:[#allocation2 + $0x528] ss:$20 sps:$4 sm:$0xff]   ;;  %v5650_v33 = vld [vmem:[%s5953_s0 + $0x14] ss:$28 sps:$4 sm:$0xff]   ;;  %vm5554_vm1 = vmmov 0  }
  0x49   :  { %v4911_v32 = vld [vmem:[#allocation2 + $0x5c] ss:$20 sps:$4 sm:$0xff]  }
  0x4a   :  { %1733 = vmatpush2.bf16.msra.mxu0 %v4819_v34  ;;  %v4914_v34 = vld [vmem:[#allocation2 + $0x504] ss:$20 sps:$4 sm:$0xff]  }
  0x4b   :  { %1776 = vmatpush2.bf16.msra.mxu1 %v4820_v35  ;;  %1734 = vmatprep.subr.bf16.mxu0 %v4821_v36  ;;  %v4909_v35 = vld [vmem:[#allocation2 + $0x58] ss:$20 sps:$4 sm:$0xff]   ;;  %v4912_v36 = vld [vmem:[#allocation2 + $0x500] ss:$20 sps:$4 sm:$0xff]  }
  0x4c   :  { %1777 = vmatprep.subr.bf16.mxu1 %v4823_v37  ;;  %v4917_v37 = vld [vmem:[#allocation2 + $0x34] ss:$20 sps:$4 sm:$0xff]  }
  0x4e   :  { %1735 = vmatpush2.bf16.msra.mxu0 %v4825_v38  ;;  %v4920_v38 = vld [vmem:[#allocation2 + $0x75c] ss:$20 sps:$4 sm:$0xff]  }
  0x4f   :  { %1778 = vmatpush2.bf16.msra.mxu1 %v4826_v39  ;;  %1736 = vmatprep.subr.bf16.mxu0 %v4827_v40  ;;  %v4915_v39 = vld [vmem:[#allocation2 + $0x30] ss:$20 sps:$4 sm:$0xff]   ;;  %v4918_v40 = vld [vmem:[#allocation2 + $0x758] ss:$20 sps:$4 sm:$0xff]  }
  0x50   :  { %1779 = vmatprep.subr.bf16.mxu1 %v4829_v41  ;;  %v4923_v41 = vld [vmem:[#allocation2 + $0xc] ss:$20 sps:$4 sm:$0xff]  }
  0x52   :  { %1737 = vmatpush2.bf16.msra.mxu0 %v4831_v42  ;;  %v4926_v42 = vld [vmem:[#allocation2 + $0x734] ss:$20 sps:$4 sm:$0xff]  }
  0x53   :  { %1780 = vmatpush2.bf16.msra.mxu1 %v4832_v43  ;;  %1738 = vmatprep.subr.bf16.mxu0 %v4833_v44  ;;  %v4921_v43 = vld [vmem:[#allocation2 + $0x8] ss:$20 sps:$4 sm:$0xff]   ;;  %v4924_v44 = vld [vmem:[#allocation2 + $0x730] ss:$20 sps:$4 sm:$0xff]  }
  0x54   :  { %1781 = vmatprep.subr.bf16.mxu1 %v4835_v45  ;;  %v4929_v45 = vld [vmem:[#allocation2 + $0x264] ss:$20 sps:$4 sm:$0xff]  }
  0x56   :  { %1739 = vmatpush2.bf16.msra.mxu0 %v4837_v46  ;;  %v4932_v46 = vld [vmem:[#allocation2 + $0x70c] ss:$20 sps:$4 sm:$0xff]  }
  0x57   :  { %1782 = vmatpush2.bf16.msra.mxu1 %v4838_v47  ;;  %1740 = vmatprep.subr.bf16.mxu0 %v4839_v49  ;;  %v4927_v47 = vld [vmem:[#allocation2 + $0x260] ss:$20 sps:$4 sm:$0xff]   ;;  %v4935_v49 = vld [vmem:[#allocation2 + $0x23c] ss:$20 sps:$4 sm:$0xff]  }
  0x58   :  { %1783 = vmatprep.subr.bf16.mxu1 %v4841_v51  ;;  %v4938_v51 = vld [vmem:[#allocation2 + $0x6e4] ss:$20 sps:$4 sm:$0xff]  }
  0x5a   :  { %1741 = vmatpush2.bf16.msra.mxu0 %v4843_v52  ;;  %v4933_v52 = vld [vmem:[#allocation2 + $0x238] ss:$20 sps:$4 sm:$0xff]  }
  0x5b   :  { %1784 = vmatpush2.bf16.msra.mxu1 %v4844_v53  ;;  %1742 = vmatprep.subr.bf16.mxu0 %v4845_v54  ;;  %v4936_v53 = vld [vmem:[#allocation2 + $0x6e0] ss:$20 sps:$4 sm:$0xff]  }
  0x5c   :  { %1785 = vmatprep.subr.bf16.mxu1 %v4847_v55  ;;  %v4941_v54 = vld [vmem:[#allocation2 + $0x214] ss:$20 sps:$4 sm:$0xff]   ;;  %v4944_v55 = vld [vmem:[#allocation2 + $0x6bc] ss:$20 sps:$4 sm:$0xff]  }
  0x5e   :  { %1743 = vmatpush2.bf16.msra.mxu0 %v4849_v56  ;;  %v4939_v56 = vld [vmem:[#allocation2 + $0x210] ss:$20 sps:$4 sm:$0xff]  }
  0x5f   :  { %1786 = vmatpush2.bf16.msra.mxu1 %v4850_v57  ;;  %1744 = vmatprep.subr.bf16.mxu0 %v4851_v58  ;;  %v4942_v57 = vld [vmem:[#allocation2 + $0x6b8] ss:$20 sps:$4 sm:$0xff]  }
  0x60   :  { %1787 = vmatprep.subr.bf16.mxu1 %v4853_v59  ;;  %v4947_v58 = vld [vmem:[#allocation2 + $0x1ec] ss:$20 sps:$4 sm:$0xff]   ;;  %v4950_v59 = vld [vmem:[#allocation2 + $0x694] ss:$20 sps:$4 sm:$0xff]  }
  0x62   :  { %1745 = vmatpush2.bf16.msra.mxu0 %v4855_v60  ;;  %v4945_v60 = vld [vmem:[#allocation2 + $0x1e8] ss:$20 sps:$4 sm:$0xff]  }
  0x63   :  { %1788 = vmatpush2.bf16.msra.mxu1 %v4856_v61  ;;  %1746 = vmatprep.subr.bf16.mxu0 %v4857_v62  ;;  %v4948_v61 = vld [vmem:[#allocation2 + $0x690] ss:$20 sps:$4 sm:$0xff]  }
  0x64   :  { %1789 = vmatprep.subr.bf16.mxu1 %v4859_v63  ;;  %v4953_v62 = vld [vmem:[#allocation2 + $0x1c4] ss:$20 sps:$4 sm:$0xff]   ;;  %v4956_v63 = vld [vmem:[#allocation2 + $0x66c] ss:$20 sps:$4 sm:$0xff]  }
  0x66   :  { %1747 = vmatpush2.bf16.msra.mxu0 %v4861_v0  ;;  %v4951_v0 = vld [vmem:[#allocation2 + $0x1c0] ss:$20 sps:$4 sm:$0xff]  }
  0x67   :  { %1790 = vmatpush2.bf16.msra.mxu1 %v4862_v1  ;;  %1802 = vmatprep.subr.bf16.mxu0 %v4871_v2  ;;  %v4954_v1 = vld [vmem:[#allocation2 + $0x668] ss:$20 sps:$4 sm:$0xff]  }
  0x68   :  { %1859 = vmatprep.subr.bf16.mxu1 %v4874_v3  ;;  %v4959_v2 = vld [vmem:[#allocation2 + $0x19c] ss:$20 sps:$4 sm:$0xff]   ;;  %v4962_v3 = vld [vmem:[#allocation2 + $0x644] ss:$20 sps:$4 sm:$0xff]  }
  0x69   :  { %1749 = vmatmul.mubr.bf16.vlgmr.msra.gmra.mxu0 %v5629_v4 }
  0x6a   :  { %1792 = vmatmul.mubr.bf16.vlgmr.msra.gmra.mxu1 %v5634_v5  ;;  %1803 = vmatpush1.bf16.msra.mxu0 %v4869_v6  ;;  %v4957_v6 = vld [vmem:[#allocation2 + $0x198] ss:$20 sps:$4 sm:$0xff]  }
  0x6b   :  { %1860 = vmatpush1.bf16.msra.mxu1 %v4872_v7  ;;  %1804 = vmatprep.subr.bf16.mxu0 %v4877_v8  ;;  %v4960_v7 = vld [vmem:[#allocation2 + $0x640] ss:$20 sps:$4 sm:$0xff]  }
  0x6c   :  { %1877 = vmatprep.mubr.bf16.mxu1 %v5552_v11  ;;  %1888 = vmatprep.subr.bf16.mxu1 %v4880_v9  ;;  %v4968_v8 = vld [vmem:[#allocation2 + $0x174] ss:$20 sps:$4 sm:$0xff]   ;;  %v4971_v9 = vld [vmem:[#allocation2 + $0x3a4] ss:$20 sps:$4 sm:$0xff]  }
  0x6d   :  { %1834 = vmatprep.mubr.bf16.mxu0 %v5650_v33 }
  0x6e   :  { %1805 = vmatpush1.bf16.msra.mxu0 %v4875_v10  ;;  %v5656_v10 = vld [vmem:[%s5953_s0 + $0x10] ss:$28 sps:$4 sm:$0xff]  }
  0x6f   :  { %1806 = vmatprep.subr.bf16.mxu0 %v4883_v12  ;;  %v4966_v12 = vld [vmem:[#allocation2 + $0x170] ss:$20 sps:$4 sm:$0xff]  }
  0x72   :  { %4415 = vmatmul.mubr.msk.bf16.vlgmr.msra.gmra.mxu1 %vm1712_vm0, %v5642_v14  ;;  %1807 = vmatpush1.bf16.msra.mxu0 %v4881_v15  ;;  %v4974_v15 = vld [vmem:[#allocation2 + $0x14c] ss:$20 sps:$4 sm:$0xff]  }
  0x73   :  { %1889 = vmatpush1.bf16.msra.mxu1 %v4878_v13  ;;  %1808 = vmatprep.subr.bf16.mxu0 %v4890_v17  ;;  %v4969_v13 = vld [vmem:[#allocation2 + $0x3a0] ss:$20 sps:$4 sm:$0xff]   ;;  %v4972_v17 = vld [vmem:[#allocation2 + $0x148] ss:$20 sps:$4 sm:$0xff]  }
  0x74   :  { %1890 = vmatprep.subr.bf16.mxu1 %v4887_v16  ;;  %1920 = vmatprep.mubr.bf16.mxu1 %v5617_v48  ;;  %v4930_v48 = vld [vmem:[#allocation2 + $0x708] ss:$20 sps:$4 sm:$0xff]  }
  0x75   :  { %v4977_v16 = vld [vmem:[#allocation2 + $0x37c] ss:$20 sps:$4 sm:$0xff]  }
  0x76   :  { %1809 = vmatpush1.bf16.msra.mxu0 %v4888_v19  ;;  %v4980_v19 = vld [vmem:[#allocation2 + $0x624] ss:$20 sps:$4 sm:$0xff]  }
  0x77   :  { %1891 = vmatpush1.bf16.msra.mxu1 %v4885_v18  ;;  %1810 = vmatprep.subr.bf16.mxu0 %v4896_v21  ;;  %v4975_v18 = vld [vmem:[#allocation2 + $0x378] ss:$20 sps:$4 sm:$0xff]   ;;  %v4978_v21 = vld [vmem:[#allocation2 + $0x620] ss:$20 sps:$4 sm:$0xff]  }
  0x78   :  { %1892 = vmatprep.subr.bf16.mxu1 %v4893_v20  ;;  %v4983_v20 = vld [vmem:[#allocation2 + $0x354] ss:$20 sps:$4 sm:$0xff]  }
  0x7a   :  { %1811 = vmatpush1.bf16.msra.mxu0 %v4894_v23  ;;  %v4986_v23 = vld [vmem:[#allocation2 + $0x5fc] ss:$20 sps:$4 sm:$0xff]  }
  0x7b   :  { %1893 = vmatpush1.bf16.msra.mxu1 %v4891_v22  ;;  %1812 = vmatprep.subr.bf16.mxu0 %v4902_v25  ;;  %v4981_v22 = vld [vmem:[#allocation2 + $0x350] ss:$20 sps:$4 sm:$0xff]   ;;  %v4984_v25 = vld [vmem:[#allocation2 + $0x5f8] ss:$20 sps:$4 sm:$0xff]  }
  0x7c   :  { %1894 = vmatprep.subr.bf16.mxu1 %v4899_v24  ;;  %v4989_v24 = vld [vmem:[#allocation2 + $0x32c] ss:$20 sps:$4 sm:$0xff]  }
  0x7e   :  { %1813 = vmatpush1.bf16.msra.mxu0 %v4900_v27  ;;  %v4992_v27 = vld [vmem:[#allocation2 + $0x5d4] ss:$20 sps:$4 sm:$0xff]  }
  0x7f   :  { %1895 = vmatpush1.bf16.msra.mxu1 %v4897_v26  ;;  %1814 = vmatprep.subr.bf16.mxu0 %v4908_v29  ;;  %v4987_v26 = vld [vmem:[#allocation2 + $0x328] ss:$20 sps:$4 sm:$0xff]   ;;  %v4990_v29 = vld [vmem:[#allocation2 + $0x5d0] ss:$20 sps:$4 sm:$0xff]  }
  0x80   :  { %1896 = vmatprep.subr.bf16.mxu1 %v4905_v28  ;;  %v4995_v28 = vld [vmem:[#allocation2 + $0x304] ss:$20 sps:$4 sm:$0xff]  }
  0x82   :  { %1815 = vmatpush1.bf16.msra.mxu0 %v4906_v31  ;;  %v5001_v31 = vld [vmem:[#allocation2 + $0x2dc] ss:$20 sps:$4 sm:$0xff]  }
  0x83   :  { %1897 = vmatpush1.bf16.msra.mxu1 %v4903_v30  ;;  %1816 = vmatprep.subr.bf16.mxu0 %v4914_v34  ;;  %v4998_v30 = vld [vmem:[#allocation2 + $0x5ac] ss:$20 sps:$4 sm:$0xff]  }
  0x84   :  { %1898 = vmatprep.subr.bf16.mxu1 %v4911_v32  ;;  %v4996_v32 = vld [vmem:[#allocation2 + $0x5a8] ss:$20 sps:$4 sm:$0xff]   ;;  %v4999_v34 = vld [vmem:[#allocation2 + $0x2d8] ss:$20 sps:$4 sm:$0xff]  }
  0x86   :  { %1817 = vmatpush1.bf16.msra.mxu0 %v4912_v36  ;;  %v5002_v36 = vld [vmem:[#allocation2 + $0x580] ss:$20 sps:$4 sm:$0xff]  }
  0x87   :  { %1899 = vmatpush1.bf16.msra.mxu1 %v4909_v35  ;;  %1818 = vmatprep.subr.bf16.mxu0 %v4920_v38  ;;  %v5007_v35 = vld [vmem:[#allocation2 + $0x2b4] ss:$20 sps:$4 sm:$0xff]   ;;  %v5013_v38 = vld [vmem:[#allocation2 + $0x28c] ss:$20 sps:$4 sm:$0xff]  }
  0x88   :  { %1900 = vmatprep.subr.bf16.mxu1 %v4917_v37  ;;  %v5005_v37 = vld [vmem:[#allocation2 + $0x2b0] ss:$20 sps:$4 sm:$0xff]  }
  0x8a   :  { %1819 = vmatpush2.bf16.msra.mxu0 %v4918_v40  ;;  %v5011_v40 = vld [vmem:[#allocation2 + $0x288] ss:$20 sps:$4 sm:$0xff]  }
  0x8b   :  { %1901 = vmatpush1.bf16.msra.mxu1 %v4915_v39  ;;  %1820 = vmatprep.subr.bf16.mxu0 %v4926_v42  ;;  %v5008_v39 = vld [vmem:[#allocation2 + $0x558] ss:$20 sps:$4 sm:$0xff]  }
  0x8c   :  { %1902 = vmatprep.subr.bf16.mxu1 %v4923_v41  ;;  %v5016_v41 = vld [vmem:[#allocation2 + $0x534] ss:$20 sps:$4 sm:$0xff]   ;;  %v5019_v42 = vld [vmem:[#allocation2 + $0x4e4] ss:$20 sps:$4 sm:$0xff]  }
  0x8e   :  { %1821 = vmatpush2.bf16.msra.mxu0 %v4924_v44  ;;  %v5017_v44 = vld [vmem:[#allocation2 + $0x4e0] ss:$20 sps:$4 sm:$0xff]  }
  0x8f   :  { %1903 = vmatpush1.bf16.msra.mxu1 %v4921_v43  ;;  %1822 = vmatprep.subr.bf16.mxu0 %v4932_v46  ;;  %v5014_v43 = vld [vmem:[#allocation2 + $0x530] ss:$20 sps:$4 sm:$0xff]  }
  0x90   :  { %1904 = vmatprep.subr.bf16.mxu1 %v4929_v45  ;;  %v5022_v45 = vld [vmem:[#allocation2 + $0x50c] ss:$20 sps:$4 sm:$0xff]   ;;  %v5025_v46 = vld [vmem:[#allocation2 + $0x4bc] ss:$20 sps:$4 sm:$0xff]  }
  0x92   :  { %1823 = vmatpush2.bf16.msra.mxu0 %v4930_v48  ;;  %v5023_v48 = vld [vmem:[#allocation2 + $0x4b8] ss:$20 sps:$4 sm:$0xff]  }
  0x93   :  { %1905 = vmatpush2.bf16.msra.mxu1 %v4927_v47  ;;  %1824 = vmatprep.subr.bf16.mxu0 %v4938_v51  ;;  %v5020_v47 = vld [vmem:[#allocation2 + $0x508] ss:$20 sps:$4 sm:$0xff]  }
  0x94   :  { %1906 = vmatprep.subr.bf16.mxu1 %v4935_v49  ;;  %v5028_v49 = vld [vmem:[#allocation2 + $0x764] ss:$20 sps:$4 sm:$0xff]   ;;  %v5031_v51 = vld [vmem:[#allocation2 + $0x494] ss:$20 sps:$4 sm:$0xff]  }
  0x96   :  { %1825 = vmatpush2.bf16.msra.mxu0 %v4936_v53  ;;  %v5029_v53 = vld [vmem:[#allocation2 + $0x490] ss:$20 sps:$4 sm:$0xff]  }
  0x97   :  { %1907 = vmatpush2.bf16.msra.mxu1 %v4933_v52  ;;  %1826 = vmatprep.subr.bf16.mxu0 %v4944_v55  ;;  %v5026_v52 = vld [vmem:[#allocation2 + $0x760] ss:$20 sps:$4 sm:$0xff]  }
  0x98   :  { %1908 = vmatprep.subr.bf16.mxu1 %v4941_v54  ;;  %v5034_v54 = vld [vmem:[#allocation2 + $0x73c] ss:$20 sps:$4 sm:$0xff]   ;;  %v5037_v55 = vld [vmem:[#allocation2 + $0x46c] ss:$20 sps:$4 sm:$0xff]  }
  0x9a   :  { %1827 = vmatpush2.bf16.msra.mxu0 %v4942_v57  ;;  %v5035_v57 = vld [vmem:[#allocation2 + $0x468] ss:$20 sps:$4 sm:$0xff]  }
  0x9b   :  { %1909 = vmatpush2.bf16.msra.mxu1 %v4939_v56  ;;  %1828 = vmatprep.subr.bf16.mxu0 %v4950_v59  ;;  %v5032_v56 = vld [vmem:[#allocation2 + $0x738] ss:$20 sps:$4 sm:$0xff]  }
  0x9c   :  { %1910 = vmatprep.subr.bf16.mxu1 %v4947_v58  ;;  %v5040_v58 = vld [vmem:[#allocation2 + $0x714] ss:$20 sps:$4 sm:$0xff]   ;;  %v5043_v59 = vld [vmem:[#allocation2 + $0x444] ss:$20 sps:$4 sm:$0xff]  }
  0x9e   :  { %1829 = vmatpush2.bf16.msra.mxu0 %v4948_v61  ;;  %v5041_v61 = vld [vmem:[#allocation2 + $0x440] ss:$20 sps:$4 sm:$0xff]  }
  0x9f   :  { %1911 = vmatpush2.bf16.msra.mxu1 %v4945_v60  ;;  %1830 = vmatprep.subr.bf16.mxu0 %v4956_v63  ;;  %v5038_v60 = vld [vmem:[#allocation2 + $0x710] ss:$20 sps:$4 sm:$0xff]  }
  0xa0   :  { %1912 = vmatprep.subr.bf16.mxu1 %v4953_v62  ;;  %v5046_v62 = vld [vmem:[#allocation2 + $0x6ec] ss:$20 sps:$4 sm:$0xff]   ;;  %v5049_v63 = vld [vmem:[#allocation2 + $0x41c] ss:$20 sps:$4 sm:$0xff]  }
  0xa2   :  { %1831 = vmatpush2.bf16.msra.mxu0 %v4954_v1  ;;  %v5047_v1 = vld [vmem:[#allocation2 + $0x418] ss:$20 sps:$4 sm:$0xff]  }
  0xa3   :  { %1913 = vmatpush2.bf16.msra.mxu1 %v4951_v0  ;;  %1832 = vmatprep.subr.bf16.mxu0 %v4962_v3  ;;  %v5044_v0 = vld [vmem:[#allocation2 + $0x6e8] ss:$20 sps:$4 sm:$0xff]  }
  0xa4   :  { %1914 = vmatprep.subr.bf16.mxu1 %v4959_v2  ;;  %v5052_v2 = vld [vmem:[#allocation2 + $0x6c4] ss:$20 sps:$4 sm:$0xff]   ;;  %v5055_v3 = vld [vmem:[#allocation2 + $0x3f4] ss:$20 sps:$4 sm:$0xff]  }
  0xa6   :  { %1833 = vmatpush2.bf16.msra.mxu0 %v4960_v7  ;;  %v5053_v7 = vld [vmem:[#allocation2 + $0x3f0] ss:$20 sps:$4 sm:$0xff]  }
  0xa7   :  { %1915 = vmatpush2.bf16.msra.mxu1 %v4957_v6  ;;  %1931 = vmatprep.subr.bf16.mxu0 %v4971_v9  ;;  %v5050_v6 = vld [vmem:[#allocation2 + $0x6c0] ss:$20 sps:$4 sm:$0xff]  }
  0xa8   :  { %1916 = vmatprep.subr.bf16.mxu1 %v4968_v8  ;;  %v5058_v8 = vld [vmem:[#allocation2 + $0x69c] ss:$20 sps:$4 sm:$0xff]   ;;  %v5061_v9 = vld [vmem:[#allocation2 + $0x3cc] ss:$20 sps:$4 sm:$0xff]  }
  0xa9   :  { %1835 = vmatmul.mubr.bf16.vlgmr.msra.gmra.mxu0 %v5656_v10 }
  0xaa   :  { %1932 = vmatpush1.bf16.msra.mxu0 %v4969_v13  ;;  %1963 = vmatprep.mubr.bf16.mxu0 %v5622_v50  ;;  %v4993_v50 = vld [vmem:[#allocation2 + $0x300] ss:$20 sps:$4 sm:$0xff]   ;;  %v5059_v13 = vld [vmem:[#allocation2 + $0x3c8] ss:$20 sps:$4 sm:$0xff]  }
  0xab   :  { %1917 = vmatpush2.bf16.msra.mxu1 %v4966_v12  ;;  %1933 = vmatprep.subr.bf16.mxu0 %v4977_v16  ;;  %v5056_v12 = vld [vmem:[#allocation2 + $0x698] ss:$20 sps:$4 sm:$0xff]  }
  0xac   :  { %1918 = vmatprep.subr.bf16.mxu1 %v4974_v15  ;;  %v5064_v15 = vld [vmem:[#allocation2 + $0x674] ss:$20 sps:$4 sm:$0xff]   ;;  %v5067_v16 = vld [vmem:[#allocation2 + $0x78c] ss:$20 sps:$4 sm:$0xff]  }
  0xae   :  { %1934 = vmatpush1.bf16.msra.mxu0 %v4975_v18  ;;  %v5065_v18 = vld [vmem:[#allocation2 + $0x788] ss:$20 sps:$4 sm:$0xff]  }
  0xaf   :  { %1919 = vmatpush2.bf16.msra.mxu1 %v4972_v17  ;;  %1935 = vmatprep.subr.bf16.mxu0 %v4983_v20  ;;  %v5062_v17 = vld [vmem:[#allocation2 + $0x670] ss:$20 sps:$4 sm:$0xff]   ;;  %v5071_v20 = vld [vmem:[#allocation2 + $0x268] ss:$20 sps:$4 sm:$0xff]  }
  0xb0   :  { %1974 = vmatprep.subr.bf16.mxu1 %v4980_v19  ;;  %v5070_v19 = vld [vmem:[#allocation2 + $0x64c] ss:$20 sps:$4 sm:$0xff]  }
  0xb2   :  { %1921 = vmatmul.mubr.bf16.vlgmr.msra.gmra.mxu1 %v5629_v4  ;;  %1936 = vmatpush1.bf16.msra.mxu0 %v4981_v22  ;;  %v5004_v4 = vld [vmem:[#allocation2 + $0x584] ss:$20 sps:$4 sm:$0xff]   ;;  %v5073_v22 = vld [vmem:[#allocation2 + $0x4e8] ss:$20 sps:$4 sm:$0xff]  }
  0xb3   :  { %1975 = vmatpush1.bf16.msra.mxu1 %v4978_v21  ;;  %1937 = vmatprep.subr.bf16.mxu0 %v4989_v24  ;;  %v5068_v21 = vld [vmem:[#allocation2 + $0x648] ss:$20 sps:$4 sm:$0xff]  }
  0xb4   :  { %1976 = vmatprep.subr.bf16.mxu1 %v4986_v23  ;;  %2006 = vmatprep.mubr.bf16.mxu1 %v5650_v33  ;;  %v5010_v33 = vld [vmem:[#allocation2 + $0x55c] ss:$20 sps:$4 sm:$0xff]  }
  0xb5   :  { %v5072_v23 = vld [vmem:[#allocation2 + $0x128] ss:$20 sps:$4 sm:$0xff]  }
  0xb6   :  { %1938 = vmatpush1.bf16.msra.mxu0 %v4987_v26  ;;  %v5074_v24 = vld [vmem:[#allocation2 + $0x3a8] ss:$20 sps:$4 sm:$0xff]   ;;  %v5077_v26 = vld [vmem:[#allocation2 + $0x4c0] ss:$20 sps:$4 sm:$0xff]  }
  0xb7   :  { %1977 = vmatpush1.bf16.msra.mxu1 %v4984_v25  ;;  %1939 = vmatprep.subr.bf16.mxu0 %v4995_v28  ;;  %v5075_v25 = vld [vmem:[#allocation2 + $0x240] ss:$20 sps:$4 sm:$0xff]   ;;  %v5079_v28 = vld [vmem:[#allocation2 + $0x218] ss:$20 sps:$4 sm:$0xff]  }
  0xb8   :  { %1978 = vmatprep.subr.bf16.mxu1 %v4992_v27  ;;  %v5078_v27 = vld [vmem:[#allocation2 + $0x380] ss:$20 sps:$4 sm:$0xff]  }
  0xba   :  { %1940 = vmatpush1.bf16.msra.mxu0 %v4993_v50  ;;  %v5080_v50 = vld [vmem:[#allocation2 + $0xd8] ss:$20 sps:$4 sm:$0xff]  }
  0xbb   :  { %1979 = vmatpush1.bf16.msra.mxu1 %v4990_v29  ;;  %1941 = vmatprep.subr.bf16.mxu0 %v5001_v31  ;;  %v5081_v29 = vld [vmem:[#allocation2 + $0x498] ss:$20 sps:$4 sm:$0xff]   ;;  %v5472_v31 = vld [vmem:[%s5953_s0 + $0x4] ss:$28 sps:$4 sm:$0xff]  }
  0xbc   :  { %1980 = vmatprep.subr.bf16.mxu1 %v4998_v30  ;;  %v5082_v30 = vld [vmem:[#allocation2 + $0x358] ss:$20 sps:$4 sm:$0xff]  }
  0xbe   :  { %1942 = vmatpush1.bf16.msra.mxu0 %v4999_v34  ;;  %v5084_v34 = vld [vmem:[#allocation2 + $0xb0] ss:$20 sps:$4 sm:$0xff]  }
  0xbf   :  { %1981 = vmatpush1.bf16.msra.mxu1 %v4996_v32  ;;  %1943 = vmatprep.subr.bf16.mxu0 %v5007_v35  ;;  %v5085_v32 = vld [vmem:[#allocation2 + $0x470] ss:$20 sps:$4 sm:$0xff]   ;;  %v5087_v35 = vld [vmem:[#allocation2 + $0x1c8] ss:$20 sps:$4 sm:$0xff]  }
  0xc0   :  { %1982 = vmatprep.subr.bf16.mxu1 %v5004_v4  ;;  %v5086_v4 = vld [vmem:[#allocation2 + $0x330] ss:$20 sps:$4 sm:$0xff]  }
  0xc2   :  { %1944 = vmatpush1.bf16.msra.mxu0 %v5005_v37  ;;  %v5088_v37 = vld [vmem:[#allocation2 + $0x88] ss:$20 sps:$4 sm:$0xff]  }
  0xc3   :  { %1983 = vmatpush1.bf16.msra.mxu1 %v5002_v36  ;;  %1945 = vmatprep.subr.bf16.mxu0 %v5013_v38  ;;  %v5089_v36 = vld [vmem:[#allocation2 + $0x448] ss:$20 sps:$4 sm:$0xff]   ;;  %v5091_v38 = vld [vmem:[#allocation2 + $0x1a0] ss:$20 sps:$4 sm:$0xff]  }
  0xc4   :  { %1984 = vmatprep.subr.bf16.mxu1 %v5010_v33  ;;  %v5090_v33 = vld [vmem:[#allocation2 + $0x308] ss:$20 sps:$4 sm:$0xff]  }
  0xc6   :  { %1946 = vmatpush1.bf16.msra.mxu0 %v5011_v40  ;;  %v5092_v40 = vld [vmem:[#allocation2 + $0x60] ss:$20 sps:$4 sm:$0xff]  }
  0xc7   :  { %1985 = vmatpush1.bf16.msra.mxu1 %v5008_v39  ;;  %1947 = vmatprep.subr.bf16.mxu0 %v5019_v42  ;;  %v5093_v39 = vld [vmem:[#allocation2 + $0x420] ss:$20 sps:$4 sm:$0xff]   ;;  %v5095_v42 = vld [vmem:[#allocation2 + $0x178] ss:$20 sps:$4 sm:$0xff]  }
  0xc8   :  { %1986 = vmatprep.subr.bf16.mxu1 %v5016_v41  ;;  %v5094_v41 = vld [vmem:[#allocation2 + $0x2e0] ss:$20 sps:$4 sm:$0xff]  }
  0xca   :  { %1948 = vmatpush2.bf16.msra.mxu0 %v5017_v44  ;;  %v5096_v44 = vld [vmem:[#allocation2 + $0x38] ss:$20 sps:$4 sm:$0xff]  }
  0xcb   :  { %1987 = vmatpush1.bf16.msra.mxu1 %v5014_v43  ;;  %1949 = vmatprep.subr.bf16.mxu0 %v5025_v46  ;;  %v5097_v43 = vld [vmem:[#allocation2 + $0x3f8] ss:$20 sps:$4 sm:$0xff]   ;;  %v5099_v46 = vld [vmem:[#allocation2 + $0x150] ss:$20 sps:$4 sm:$0xff]  }
  0xcc   :  { %1988 = vmatprep.subr.bf16.mxu1 %v5022_v45  ;;  %v5098_v45 = vld [vmem:[#allocation2 + $0x2b8] ss:$20 sps:$4 sm:$0xff]  }
  0xce   :  { %1950 = vmatpush2.bf16.msra.mxu0 %v5023_v48  ;;  %v5100_v48 = vld [vmem:[#allocation2 + $0x10] ss:$20 sps:$4 sm:$0xff]  }
  0xcf   :  { %1989 = vmatpush1.bf16.msra.mxu1 %v5020_v47  ;;  %1951 = vmatprep.subr.bf16.mxu0 %v5031_v51  ;;  %v5101_v47 = vld [vmem:[#allocation2 + $0x3d0] ss:$20 sps:$4 sm:$0xff]   ;;  %v5103_v51 = vld [vmem:[#allocation2 + $0x768] ss:$20 sps:$4 sm:$0xff]  }
  0xd0   :  { %1990 = vmatprep.subr.bf16.mxu1 %v5028_v49  ;;  %v5102_v49 = vld [vmem:[#allocation2 + $0x290] ss:$20 sps:$4 sm:$0xff]  }
  0xd2   :  { %1952 = vmatpush2.bf16.msra.mxu0 %v5029_v53  ;;  %v5119_v53 = vld [vmem:[#allocation2 + $0x790] ss:$20 sps:$4 sm:$0xff]  }
  0xd3   :  { %1991 = vmatpush2.bf16.msra.mxu1 %v5026_v52  ;;  %1953 = vmatprep.subr.bf16.mxu0 %v5037_v55  ;;  %v5104_v52 = vld [vmem:[#allocation2 + $0x628] ss:$20 sps:$4 sm:$0xff]  }
  0xd4   :  { %1992 = vmatprep.subr.bf16.mxu1 %v5034_v54  ;;  %v5105_v54 = vld [vmem:[#allocation2 + $0x740] ss:$20 sps:$4 sm:$0xff]   ;;  %v5122_v55 = vld [vmem:[#allocation4 + $0xe4] ss:$16 sps:$4 sm:$0xff]  }
  0xd6   :  { %1954 = vmatpush2.bf16.msra.mxu0 %v5035_v57  ;;  %v5106_v57 = vld [vmem:[#allocation2 + $0x600] ss:$20 sps:$4 sm:$0xff]  }
  0xd7   :  { %1993 = vmatpush2.bf16.msra.mxu1 %v5032_v56  ;;  %1955 = vmatprep.subr.bf16.mxu0 %v5043_v59  ;;  %v5553_v56 = vmov 0.0   ;;  %v5475_v59 = vld [vmem:[%s5953_s0 + $0x8] ss:$28 sps:$4 sm:$0xff]  }
  0xd8   :  { %1994 = vmatprep.subr.bf16.mxu1 %v5040_v58  ;;  %v5474_v58 = vld [vmem:[%s5953_s0] ss:$28 sps:$4 sm:$0xff]  }
  0xda   :  { %1956 = vmatpush2.bf16.msra.mxu0 %v5041_v61  ;;  %v5476_v61 = vld [vmem:[%s5953_s0 + $0x14] ss:$28 sps:$4 sm:$0xff]  }
  0xdb   :  { %1995 = vmatpush2.bf16.msra.mxu1 %v5038_v60  ;;  %1957 = vmatprep.subr.bf16.mxu0 %v5049_v63  ;;  %v5107_v60 = vld [vmem:[#allocation2 + $0x718] ss:$20 sps:$4 sm:$0xff]  }
  0xdc   :  { %1996 = vmatprep.subr.bf16.mxu1 %v5046_v62  ;;  %v5108_v62 = vld [vmem:[#allocation2 + $0x5d8] ss:$20 sps:$4 sm:$0xff]  }
  0xdd   :  { %v5120_v63 = vld [vmem:[#allocation4 + $0xe0] ss:$16 sps:$4 sm:$0xff]  }
  0xde   :  { %1958 = vmatpush2.bf16.msra.mxu0 %v5047_v1  ;;  %v5125_v1 = vld [vmem:[#allocation4 + $0xc4] ss:$16 sps:$4 sm:$0xff]  }
  0xdf   :  { %1997 = vmatpush2.bf16.msra.mxu1 %v5044_v0  ;;  %1959 = vmatprep.subr.bf16.mxu0 %v5055_v3  ;;  %v5109_v0 = vld [vmem:[#allocation2 + $0x6f0] ss:$20 sps:$4 sm:$0xff]   ;;  %v5123_v3 = vld [vmem:[#allocation4 + $0xc0] ss:$16 sps:$4 sm:$0xff]  }
  0xe0   :  { %1998 = vmatprep.subr.bf16.mxu1 %v5052_v2  ;;  %v5110_v2 = vld [vmem:[#allocation2 + $0x5b0] ss:$20 sps:$4 sm:$0xff]  }
  0xe2   :  { %1960 = vmatpush2.bf16.msra.mxu0 %v5053_v7  ;;  %v5477_v7 = vld [vmem:[%s5953_s0 + $0x18] ss:$28 sps:$4 sm:$0xff]  }
  0xe3   :  { %1999 = vmatpush2.bf16.msra.mxu1 %v5050_v6  ;;  %1961 = vmatprep.subr.bf16.mxu0 %v5061_v9  ;;  %v5111_v6 = vld [vmem:[#allocation2 + $0x6c8] ss:$20 sps:$4 sm:$0xff]  }
  0xe4   :  { %2000 = vmatprep.subr.bf16.mxu1 %v5058_v8  ;;  %v5128_v8 = vld [vmem:[#allocation4 + $0xa4] ss:$16 sps:$4 sm:$0xff]  }
  0xe5   :  { %v5112_v9 = vld [vmem:[#allocation2 + $0x588] ss:$20 sps:$4 sm:$0xff]  }
  0xe6   :  { %1962 = vmatpush2.bf16.msra.mxu0 %v5059_v13  ;;  %v5113_v13 = vld [vmem:[#allocation2 + $0x6a0] ss:$20 sps:$4 sm:$0xff]  }
  0xe7   :  { %2001 = vmatpush2.bf16.msra.mxu1 %v5056_v12  ;;  %2031 = vmatprep.subr.bf16.mxu0 %v5067_v16  ;;  %v5126_v12 = vld [vmem:[#allocation4 + $0xa0] ss:$16 sps:$4 sm:$0xff]   ;;  %v5114_v16 = vld [vmem:[#allocation2 + $0x560] ss:$20 sps:$4 sm:$0xff]  }
  0xe8   :  { %2002 = vmatprep.subr.bf16.mxu1 %v5064_v15  ;;  %v5131_v15 = vld [vmem:[#allocation4 + $0x84] ss:$16 sps:$4 sm:$0xff]  }
  0xe9   :  { %1964 = vmatmul.mubr.bf16.vlgmr.msra.gmra.mxu0 %v5634_v5  ;;  %v5076_v5 = vld [vmem:[#allocation2 + $0x100] ss:$20 sps:$4 sm:$0xff]  }
  0xea   :  { %2032 = vmatpush1.bf16.msra.mxu0 %v5065_v18  ;;  %2049 = vmatprep.mubr.bf16.mxu0 %v5552_v11  ;;  %v5115_v18 = vld [vmem:[#allocation2 + $0x678] ss:$20 sps:$4 sm:$0xff]  }
  0xeb   :  { %2003 = vmatpush2.bf16.msra.mxu1 %v5062_v17  ;;  %4659 = vmatprep.subr.bf16.mxu0 %v5071_v20  ;;  %v5129_v17 = vld [vmem:[#allocation4 + $0x80] ss:$16 sps:$4 sm:$0xff]  }
  0xec   :  { %2004 = vmatprep.subr.bf16.mxu1 %v5070_v19  ;;  %v5134_v19 = vld [vmem:[#allocation4 + $0x64] ss:$16 sps:$4 sm:$0xff]  }
  0xed   :  { %v5116_v20 = vld [vmem:[#allocation2 + $0x538] ss:$20 sps:$4 sm:$0xff]  }
  0xef   :  { %2005 = vmatpush2.bf16.msra.mxu1 %v5068_v21  ;;  %v5132_v21 = vld [vmem:[#allocation4 + $0x60] ss:$16 sps:$4 sm:$0xff]  }
  0xf0   :  { %4681 = vmatprep.subr.bf16.mxu1 %v5073_v22  ;;  %v5117_v22 = vld [vmem:[#allocation2 + $0x650] ss:$20 sps:$4 sm:$0xff]  }
  0xf1   :  { %4416 = vmatmul.mubr.msk.bf16.vlgmr.msra.gmra.mxu0 %vm1712_vm0, %v5642_v14  ;;  %v5083_v14 = vld [vmem:[#allocation2 + $0x1f0] ss:$20 sps:$4 sm:$0xff]  }
  0xf2   :  { %2007 = vmatmul.mubr.bf16.vlgmr.msra.gmra.mxu1 %v5656_v10  ;;  %4660 = vmatpush3.bf16.msra.mxu0 %v5072_v23  ;;  %v5473_v10 = vld [vmem:[%s5953_s0 + $0xc] ss:$28 sps:$4 sm:$0xff]  }
  0xf3   :  { %4682 = vmatpush3.bf16.msra.mxu1 %v5074_v24  ;;  %4661 = vmatprep.subr.bf16.mxu0 %v5075_v25  ;;  %v5137_v23 = vld [vmem:[#allocation4 + $0x44] ss:$16 sps:$4 sm:$0xff]   ;;  %v5118_v24 = vld [vmem:[#allocation2 + $0x510] ss:$20 sps:$4 sm:$0xff]   ;;  %v5135_v25 = vld [vmem:[#allocation4 + $0x40] ss:$16 sps:$4 sm:$0xff]  }
  0xf4   :  { %4683 = vmatprep.subr.bf16.mxu1 %v5077_v26  ;;  %2092 = vmatprep.mubr.bf16.mxu0 %v5472_v31  ;;  %v5140_v26 = vld [vmem:[#allocation4 + $0x24] ss:$16 sps:$4 sm:$0xff]  }
  0xf5   :  { %2133 = vmatprep.mubr.bf16.mxu1 %v5473_v10  ;;  %v5478_v31 = vld [vmem:[%s5953_s0 + $0x10] ss:$28 sps:$4 sm:$0xff]  }
  0xf6   :  { %4662 = vmatpush3.bf16.msra.mxu0 %v5076_v5  ;;  %v5170_v5 = vld [vmem:[#allocation4 + $0x2e4] ss:$16 sps:$4 sm:$0xff]  }
  0xf7   :  { %4684 = vmatpush3.bf16.msra.mxu1 %v5078_v27  ;;  %4663 = vmatprep.subr.bf16.mxu0 %v5079_v28  ;;  %v5138_v27 = vld [vmem:[#allocation4 + $0x20] ss:$16 sps:$4 sm:$0xff]   ;;  %v5143_v28 = vld [vmem:[#allocation4 + $0x4] ss:$16 sps:$4 sm:$0xff]  }
  0xf8   :  { %4685 = vmatprep.subr.bf16.mxu1 %v5081_v29  ;;  %v5168_v29 = vld [vmem:[#allocation4 + $0x2e0] ss:$16 sps:$4 sm:$0xff]   ;;  %v5146_v10 = vld [vmem:[#allocation4 + $0x1e4] ss:$16 sps:$4 sm:$0xff]  }
  0xfa   :  { %4664 = vmatpush3.bf16.msra.mxu0 %v5080_v50  ;;  %v5173_v50 = vld [vmem:[#allocation4 + $0x2c4] ss:$16 sps:$4 sm:$0xff]  }
  0xfb   :  { %4686 = vmatpush3.bf16.msra.mxu1 %v5082_v30  ;;  %4665 = vmatprep.subr.bf16.mxu0 %v5083_v14  ;;  %v5141_v30 = vld [vmem:[#allocation4] ss:$16 sps:$4 sm:$0xff]  }
  0xfc   :  { %4687 = vmatprep.subr.bf16.mxu1 %v5085_v32  ;;  %v5171_v14 = vld [vmem:[#allocation4 + $0x2c0] ss:$16 sps:$4 sm:$0xff]   ;;  %v5176_v32 = vld [vmem:[#allocation4 + $0x2a4] ss:$16 sps:$4 sm:$0xff]  }
  0xfe   :  { %4666 = vmatpush3.bf16.msra.mxu0 %v5084_v34  ;;  %v5144_v34 = vld [vmem:[#allocation4 + $0x1e0] ss:$16 sps:$4 sm:$0xff]  }
  0xff   :  { %4688 = vmatpush3.bf16.msra.mxu1 %v5086_v4  ;;  %4667 = vmatprep.subr.bf16.mxu0 %v5087_v35  ;;  %v5149_v4 = vld [vmem:[#allocation4 + $0x1c4] ss:$16 sps:$4 sm:$0xff]   ;;  %v5174_v35 = vld [vmem:[#allocation4 + $0x2a0] ss:$16 sps:$4 sm:$0xff]  }
 0x100   :  { %4689 = vmatprep.subr.bf16.mxu1 %v5089_v36  ;;  %v5179_v36 = vld [vmem:[#allocation4 + $0x284] ss:$16 sps:$4 sm:$0xff]  }
 0x102   :  { %4668 = vmatpush3.bf16.msra.mxu0 %v5088_v37  ;;  %v5147_v37 = vld [vmem:[#allocation4 + $0x1c0] ss:$16 sps:$4 sm:$0xff]  }
 0x103   :  { %4690 = vmatpush3.bf16.msra.mxu1 %v5090_v33  ;;  %4669 = vmatprep.subr.bf16.mxu0 %v5091_v38  ;;  %v5152_v33 = vld [vmem:[#allocation4 + $0x1a4] ss:$16 sps:$4 sm:$0xff]   ;;  %v5177_v38 = vld [vmem:[#allocation4 + $0x280] ss:$16 sps:$4 sm:$0xff]  }
 0x104   :  { %4691 = vmatprep.subr.bf16.mxu1 %v5093_v39  ;;  %v5182_v39 = vld [vmem:[#allocation4 + $0x264] ss:$16 sps:$4 sm:$0xff]  }
 0x106   :  { %4670 = vmatpush3.bf16.msra.mxu0 %v5092_v40  ;;  %v5150_v40 = vld [vmem:[#allocation4 + $0x1a0] ss:$16 sps:$4 sm:$0xff]  }
 0x107   :  { %4692 = vmatpush3.bf16.msra.mxu1 %v5094_v41  ;;  %4671 = vmatprep.subr.bf16.mxu0 %v5095_v42  ;;  %v5155_v41 = vld [vmem:[#allocation4 + $0x184] ss:$16 sps:$4 sm:$0xff]   ;;  %v5180_v42 = vld [vmem:[#allocation4 + $0x260] ss:$16 sps:$4 sm:$0xff]  }
 0x108   :  { %4693 = vmatprep.subr.bf16.mxu1 %v5097_v43  ;;  %v5185_v43 = vld [vmem:[#allocation4 + $0x244] ss:$16 sps:$4 sm:$0xff]  }
 0x10a   :  { %4672 = vmatpush3.bf16.msra.mxu0 %v5096_v44  ;;  %v5153_v44 = vld [vmem:[#allocation4 + $0x180] ss:$16 sps:$4 sm:$0xff]  }
 0x10b   :  { %4694 = vmatpush3.bf16.msra.mxu1 %v5098_v45  ;;  %4673 = vmatprep.subr.bf16.mxu0 %v5099_v46  ;;  %v5158_v45 = vld [vmem:[#allocation4 + $0x164] ss:$16 sps:$4 sm:$0xff]   ;;  %v5183_v46 = vld [vmem:[#allocation4 + $0x240] ss:$16 sps:$4 sm:$0xff]  }
 0x10c   :  { %4695 = vmatprep.subr.bf16.mxu1 %v5101_v47  ;;  %v5188_v47 = vld [vmem:[#allocation4 + $0x224] ss:$16 sps:$4 sm:$0xff]  }
 0x10e   :  { %4674 = vmatpush3.bf16.msra.mxu0 %v5100_v48  ;;  %v5156_v48 = vld [vmem:[#allocation4 + $0x160] ss:$16 sps:$4 sm:$0xff]  }
 0x10f   :  { %4696 = vmatpush3.bf16.msra.mxu1 %v5102_v49  ;;  %4703 = vmatprep.subr.bf16.mxu0 %v5103_v51  ;;  %v5161_v49 = vld [vmem:[#allocation4 + $0x144] ss:$16 sps:$4 sm:$0xff]   ;;  %v5186_v51 = vld [vmem:[#allocation4 + $0x220] ss:$16 sps:$4 sm:$0xff]  }
 0x110   :  { %4749 = vmatprep.subr.bf16.mxu1 %v5553_v56 }
 0x111   :  { %2093 = vmatmul.mubr.bf16.vlgmr.msra.gmra.mxu0 %v5474_v58  ;;  %v5192_v58 = vld [vmem:[#allocation4 + $0x3e0] ss:$16 sps:$4 sm:$0xff]  }
 0x112   :  { %2134 = vmatmul.mubr.bf16.vlgmr.msra.gmra.mxu1 %v5475_v59  ;;  %4704 = vmatpush3.bf16.msra.mxu0 %v5104_v52  ;;  %v5191_v52 = vld [vmem:[#allocation4 + $0x204] ss:$16 sps:$4 sm:$0xff]  }
 0x113   :  { %4750 = vmatpush3.bf16.msra.mxu1 %v5119_v53  ;;  %4705 = vmatprep.subr.bf16.mxu0 %v5105_v54  ;;  %v5159_v53 = vld [vmem:[#allocation4 + $0x140] ss:$16 sps:$4 sm:$0xff]   ;;  %v5164_v54 = vld [vmem:[#allocation4 + $0x124] ss:$16 sps:$4 sm:$0xff]  }
 0x114   :  { %2174 = vmatprep.mubr.bf16.mxu0 %v5476_v61  ;;  %4751 = vmatprep.mubr.msk.bf16.mxu1 %vm5554_vm1, %v5553_v56  ;;  %v5194_v56 = vld [vmem:[#allocation4 + $0x3e4] ss:$16 sps:$4 sm:$0xff]   ;;  %v5165_v61 = vld [vmem:[#allocation4 + $0x100] ss:$16 sps:$4 sm:$0xff]  }
 0x115   :  { %3221 = vmatprep.subr.bf16.mxu1 %v5122_v55  ;;  %v5189_v55 = vld [vmem:[#allocation4 + $0x200] ss:$16 sps:$4 sm:$0xff]   ;;  %v5167_v59 = vld [vmem:[#allocation4 + $0x104] ss:$16 sps:$4 sm:$0xff]  }
 0x116   :  { %4706 = vmatpush3.bf16.msra.mxu0 %v5106_v57  ;;  %v5162_v57 = vld [vmem:[#allocation4 + $0x120] ss:$16 sps:$4 sm:$0xff]  }
 0x117   :  { %4707 = vmatprep.subr.bf16.mxu0 %v5107_v60  ;;  %v5197_v60 = vld [vmem:[#allocation4 + $0x3c4] ss:$16 sps:$4 sm:$0xff]  }
 0x11a   :  { %4752 = vmatmul.mubr.msk.bf16.vlgmr.msra.gmra.mxu1 %vm1712_vm0, %v5477_v7  ;;  %4708 = vmatpush3.bf16.msra.mxu0 %v5108_v62  ;;  %v5195_v62 = vld [vmem:[#allocation4 + $0x3c0] ss:$16 sps:$4 sm:$0xff]  }
 0x11b   :  { %3222 = vmatpush1.bf16.msra.mxu1 %v5120_v63  ;;  %4709 = vmatprep.subr.bf16.mxu0 %v5109_v0  ;;  %v5200_v63 = vld [vmem:[#allocation4 + $0x3a4] ss:$16 sps:$4 sm:$0xff]   ;;  %v378_v0 = vlaneseq  ;;  %v5201_v7 = vld [vmem:[#allocation4 + $0x380] ss:$16 sps:$4 sm:$0xff]  }
 0x11c   :  { %3223 = vmatprep.subr.bf16.mxu1 %v5125_v1  ;;  %v5198_v1 = vld [vmem:[#allocation4 + $0x3a0] ss:$16 sps:$4 sm:$0xff]  }
 0x11e   :  { %4710 = vmatpush3.bf16.msra.mxu0 %v5110_v2 }
 0x11f   :  { %3224 = vmatpush1.bf16.msra.mxu1 %v5123_v3  ;;  %4711 = vmatprep.subr.bf16.mxu0 %v5111_v6  ;;  %v5203_v3 = vld [vmem:[#allocation4 + $0x384] ss:$16 sps:$4 sm:$0xff]   ;;  %v5689_v6 = vshrl.u32 %v378_v0, 7 }
 0x120   :  { %3225 = vmatprep.subr.bf16.mxu1 %v5128_v8  ;;  %v5263_v0 = vld [vmem:[#allocation4 + $0x484] ss:$16 sps:$4 sm:$0xff]  }
 0x122   :  { %4712 = vmatpush3.bf16.msra.mxu0 %v5112_v9 }
 0x123   :  { %3226 = vmatpush1.bf16.msra.mxu1 %v5126_v12  ;;  %4713 = vmatprep.subr.bf16.mxu0 %v5113_v13  ;;  %v5206_v12 = vld [vmem:[#allocation4 + $0x364] ss:$16 sps:$4 sm:$0xff]   ;;  %v5692_v13 = vsub.s32 0, %v5689_v6 }
 0x124   :  { %3227 = vmatprep.subr.bf16.mxu1 %v5131_v15  ;;  %v5695_v15 = vsub.s32 1, %v5689_v6 }
 0x126   :  { %4714 = vmatpush3.bf16.msra.mxu0 %v5114_v16  ;;  %v5204_v16 = vld [vmem:[#allocation4 + $0x360] ss:$16 sps:$4 sm:$0xff]  }
 0x127   :  { %3228 = vmatpush1.bf16.msra.mxu1 %v5129_v17  ;;  %4715 = vmatprep.subr.bf16.mxu0 %v5115_v18  ;;  %v5700_v17 = vld [vmem:[%s5955_s2] sm:$0x1f] }
 0x128   :  { %3229 = vmatprep.subr.bf16.mxu1 %v5134_v19 }
 0x129   :  { %v1750_v8 = vpop.f32.mrf.mxu0 }
 0x12a   :  { %4716 = vmatpush3.bf16.msra.mxu0 %v5116_v20  ;;  %v1793_v2 = vpop.f32.mrf.mxu1  ;;  %v5209_v20 = vld [vmem:[#allocation4 + $0x344] ss:$16 sps:$4 sm:$0xff]  }
 0x12b   :  { %3230 = vmatpush1.bf16.msra.mxu1 %v5132_v21  ;;  %4717 = vmatprep.subr.bf16.mxu0 %v5117_v22  ;;  %v1752_v18 = vpop.f32.mrf.mxu0  ;;  %v5245_v21 = vld [vmem:[#allocation4 + $0x4e4] ss:$16 sps:$4 sm:$0xff]   ;;  %v385_v22 = vrot.slane %v5700_v17, %v5695_v15 }
 0x12c   :  { %3231 = vmatprep.subr.bf16.mxu1 %v5137_v23  ;;  %v1795_v9 = vpop.f32.mrf.mxu1  ;;  %v5207_v23 = vld [vmem:[#allocation4 + $0x340] ss:$16 sps:$4 sm:$0xff]  }
 0x12e   :  { %4718 = vmatpush3.bf16.msra.mxu0 %v5118_v24  ;;  %v1797_v19 = vpop.f32.mrf.mxu1  ;;  %v381_v24 = vrot.slane %v5700_v17, %v5692_v13 }
 0x12f   :  { %3232 = vmatpush1.bf16.msra.mxu1 %v5135_v25  ;;  %3264 = vmatprep.subr.bf16.mxu0 %v5170_v5  ;;  %v1754_v25 = vpop.f32.mrf.mxu0  ;;  %v5212_v5 = vld [vmem:[#allocation4 + $0x324] ss:$16 sps:$4 sm:$0xff]  }
 0x130   :  { %3233 = vmatprep.subr.bf16.mxu1 %v5140_v26  ;;  %v1799_v26 = vpop.f32.mrf.mxu1 }
 0x131   :  { %2175 = vmatmul.mubr.bf16.vlgmr.msra.gmra.mxu0 %v5478_v31  ;;  %v5215_v31 = vld [vmem:[#allocation4 + $0x304] ss:$16 sps:$4 sm:$0xff]  }
 0x132   :  { %3265 = vmatpush1.bf16.msra.mxu0 %v5168_v29  ;;  %v5210_v29 = vld [vmem:[#allocation4 + $0x320] ss:$16 sps:$4 sm:$0xff]  }
 0x133   :  { %3234 = vmatpush1.bf16.msra.mxu1 %v5138_v27  ;;  %3266 = vmatprep.subr.bf16.mxu0 %v5173_v50  ;;  %v1879_v27 = vpop.f32.mrf.mxu1  ;;  %v1751_v50 = vadd.f32 %v1750_v8, %v381_v24  ;;  %v5273_v8 = vld [vmem:[#allocation4 + $0x440] ss:$16 sps:$4 sm:$0xff]  }
 0x134   :  { %3235 = vmatprep.subr.bf16.mxu1 %v5143_v28  ;;  %v1753_v28 = vadd.f32 %v1752_v18, %v385_v22  ;;  %v5285_v18 = vld [vmem:[#allocation4 + $0x400] ss:$16 sps:$4 sm:$0xff]  }
 0x136   :  { %3267 = vmatpush1.bf16.msra.mxu0 %v5171_v14  ;;  %v1881_v14 = vpop.f32.mrf.mxu1 }
 0x137   :  { %3236 = vmatpush1.bf16.msra.mxu1 %v5141_v30  ;;  %3268 = vmatprep.subr.bf16.mxu0 %v5176_v32  ;;  %v1756_v30 = vpop.f32.mrf.mxu0 }
 0x138   :  { %3237 = vmatprep.subr.bf16.mxu1 %v5146_v10  ;;  %v1755_v10 = vadd.f32 %v1754_v25, %v381_v24 }
 0x13a   :  { %3269 = vmatpush1.bf16.msra.mxu0 %v5174_v35  ;;  %v5213_v35 = vld [vmem:[#allocation4 + $0x300] ss:$16 sps:$4 sm:$0xff]  }
 0x13b   :  { %3238 = vmatpush2.bf16.msra.mxu1 %v5144_v34  ;;  %3270 = vmatprep.subr.bf16.mxu0 %v5179_v36  ;;  %v1796_v34 = vadd.f32 %v1795_v9, %v1753_v28  ;;  %v1794_v36 = vadd.f32 %v1793_v2, %v1751_v50  ;;  %v5269_v2 = vld [vmem:[#allocation4 + $0x464] ss:$16 sps:$4 sm:$0xff]  }
 0x13c   :  { %3239 = vmatprep.subr.bf16.mxu1 %v5149_v4  ;;  %v1757_v4 = vadd.f32 %v1756_v30, %v385_v22  ;;  %v5281_v9 = vld [vmem:[#allocation4 + $0x424] ss:$16 sps:$4 sm:$0xff]   ;;  %v392_v22 = vsub.s32 3, %v5689_v6 }
 0x13e   :  { %3271 = vmatpush1.bf16.msra.mxu0 %v5177_v38  ;;  %v1798_v38 = vadd.f32 %v1797_v19, %v1755_v10  ;;  %v5293_v19 = vld [vmem:[#allocation4 + $0x2ec] ss:$16 sps:$4 sm:$0xff]  }
 0x13f   :  { %3240 = vmatpush2.bf16.msra.mxu1 %v5147_v37  ;;  %3272 = vmatprep.subr.bf16.mxu0 %v5182_v39 }
 0x140   :  { %3241 = vmatprep.subr.bf16.mxu1 %v5152_v33  ;;  %v5218_v33 = vld [vmem:[#allocation4 + $0xec] ss:$16 sps:$4 sm:$0xff]  }
 0x142   :  { %3273 = vmatpush1.bf16.msra.mxu0 %v5180_v42 }
 0x143   :  { %3242 = vmatpush2.bf16.msra.mxu1 %v5150_v40  ;;  %3274 = vmatprep.subr.bf16.mxu0 %v5185_v43  ;;  %v1883_v40 = vpop.f32.mrf.mxu1  ;;  %v1800_v43 = vadd.f32 %v1799_v26, %v1757_v4 }
 0x144   :  { %3243 = vmatprep.subr.bf16.mxu1 %v5155_v41 }
 0x146   :  { %3275 = vmatpush1.bf16.msra.mxu0 %v5183_v46 }
 0x147   :  { %3244 = vmatpush2.bf16.msra.mxu1 %v5153_v44  ;;  %3276 = vmatprep.subr.bf16.mxu0 %v5188_v47 }
 0x148   :  { %3245 = vmatprep.subr.bf16.mxu1 %v5158_v45 }
 0x14a   :  { %3277 = vmatpush1.bf16.msra.mxu0 %v5186_v51 }
 0x14b   :  { %3246 = vmatpush2.bf16.msra.mxu1 %v5156_v48  ;;  %3278 = vmatprep.subr.bf16.mxu0 %v5191_v52 }
 0x14c   :  { %3247 = vmatprep.subr.bf16.mxu1 %v5161_v49  ;;  %v1885_v49 = vpop.f32.mrf.mxu1 }
 0x14e   :  { %3279 = vmatpush1.bf16.msra.mxu0 %v5189_v55 }
 0x14f   :  { %3248 = vmatpush2.bf16.msra.mxu1 %v5159_v53  ;;  %3280 = vmatprep.subr.bf16.mxu0 %v5194_v56 }
 0x150   :  { %3249 = vmatprep.subr.bf16.mxu1 %v5164_v54 }
 0x152   :  { %3281 = vmatpush2.bf16.msra.mxu0 %v5192_v58  ;;  %v5243_v58 = vld [vmem:[#allocation4 + $0x4e0] ss:$16 sps:$4 sm:$0xff]  }
 0x153   :  { %3250 = vmatpush2.bf16.msra.mxu1 %v5162_v57  ;;  %3282 = vmatprep.subr.bf16.mxu0 %v5197_v60  ;;  %v5251_v60 = vld [vmem:[#allocation4 + $0x4c4] ss:$16 sps:$4 sm:$0xff]  }
 0x154   :  { %3251 = vmatprep.subr.bf16.mxu1 %v5167_v59 }
 0x156   :  { %3283 = vmatpush2.bf16.msra.mxu0 %v5195_v62  ;;  %v5257_v62 = vld [vmem:[#allocation4 + $0x4a4] ss:$16 sps:$4 sm:$0xff]  }
 0x157   :  { %3252 = vmatpush2.bf16.msra.mxu1 %v5165_v61  ;;  %3284 = vmatprep.subr.bf16.mxu0 %v5200_v63  ;;  %v5249_v61 = vld [vmem:[#allocation4 + $0x4c0] ss:$16 sps:$4 sm:$0xff]  }
 0x158   :  { %3307 = vmatprep.subr.bf16.mxu1 %v5245_v21  ;;  %v5255_v63 = vld [vmem:[#allocation4 + $0x4a0] ss:$16 sps:$4 sm:$0xff]  }
 0x15a   :  { %3285 = vmatpush2.bf16.msra.mxu0 %v5198_v1  ;;  %v5261_v1 = vld [vmem:[#allocation4 + $0x480] ss:$16 sps:$4 sm:$0xff]  }
 0x15b   :  { %3286 = vmatprep.subr.bf16.mxu0 %v5203_v3  ;;  %v5267_v3 = vld [vmem:[#allocation4 + $0x460] ss:$16 sps:$4 sm:$0xff]  }
 0x15e   :  { %3287 = vmatpush2.bf16.msra.mxu0 %v5201_v7  ;;  %v5275_v7 = vld [vmem:[#allocation4 + $0x444] ss:$16 sps:$4 sm:$0xff]  }
 0x15f   :  { %3288 = vmatprep.subr.bf16.mxu0 %v5206_v12  ;;  %v5279_v12 = vld [vmem:[#allocation4 + $0x420] ss:$16 sps:$4 sm:$0xff]  }
 0x162   :  { %3289 = vmatpush2.bf16.msra.mxu0 %v5204_v16  ;;  %v5287_v16 = vld [vmem:[#allocation4 + $0x404] ss:$16 sps:$4 sm:$0xff]  }
 0x163   :  { %3290 = vmatprep.subr.bf16.mxu0 %v5209_v20 }
 0x166   :  { %3291 = vmatpush2.bf16.msra.mxu0 %v5207_v23  ;;  %v388_v23 = vsub.s32 2, %v5689_v6 }
 0x167   :  { %3292 = vmatprep.subr.bf16.mxu0 %v5212_v5  ;;  %v393_v5 = vrot.slane %v5700_v17, %v392_v22 }
 0x169   :  { %v1836_v32 = vpop.f32.mrf.mxu0 }
 0x16a   :  { %3293 = vmatpush2.bf16.msra.mxu0 %v5210_v29  ;;  %v1837_v41 = vadd.f32 %v1836_v32, %v1794_v36 }
 0x16b   :  { %v1838_v37 = vpop.f32.mrf.mxu0  ;;  %3294 = vmatprep.subr.bf16.mxu0 %v5215_v31 }
 0x16c   :  { %v1839_v39 = vadd.f32 %v1838_v37, %v1796_v34  ;;  %v1880_v51 = vadd.f32 %v1879_v27, %v1837_v41  ;;  %v389_v27 = vrot.slane %v5700_v17, %v388_v23 }
 0x16d   :  { %v1840_v42 = vpop.f32.mrf.mxu0 }
 0x16e   :  { %v1841_v44 = vadd.f32 %v1840_v42, %v1798_v38  ;;  %3295 = vmatpush2.bf16.msra.mxu0 %v5213_v35  ;;  %v1882_v46 = vadd.f32 %v1881_v14, %v1839_v39  ;;  %v2224_v56 = vmax.f32 %v1880_v51, 0.0 }
 0x16f   :  { %v1842_v45 = vpop.f32.mrf.mxu0  ;;  %3350 = vmatprep.subr.bf16.mxu0 %v5218_v33 }
 0x170   :  { %v1884_v47 = vadd.f32 %v1883_v40, %v1841_v44  ;;  %v1843_v48 = vadd.f32 %v1842_v45, %v1800_v43  ;;  %v2225_v54 = vmax.f32 %v1882_v46, 0.0 }
 0x172   :  { %v1886_v52 = vadd.f32 %v1885_v49, %v1843_v48  ;;  %v2229_v53 = vmax.f32 %v1884_v47, 0.0  ;;  %v1922_v20 = vpop.f32.mrf.mxu1 }
 0x173   :  { %v1923_v31 = vadd.f32 %v1922_v20, %v389_v27 }
 0x174   :  { %v2230_v55 = vmax.f32 %v1886_v52, 0.0  ;;  %v5708_v59 = vpack.c.bf16 %v2229_v53, %v2224_v56  ;;  %v1924_v21 = vpop.f32.mrf.mxu1 }
 0x175   :  { %v1925_v30 = vadd.f32 %v1924_v21, %v393_v5  ;;  %v5239_v21 = vld [vmem:[#allocation4 + $0xc] ss:$16 sps:$4 sm:$0xff]  }
 0x176   :  { %v5706_v57 = vpack.c.bf16 %v2230_v55, %v2225_v54  ;;  %v1926_v25 = vpop.f32.mrf.mxu1 }
 0x177   :  { %v1927_v32 = vadd.f32 %v1926_v25, %v389_v27  ;;  %v5237_v25 = vld [vmem:[#allocation4 + $0x8] ss:$16 sps:$4 sm:$0xff]  }
 0x178   :  { %3253 = vmatprep.mubr.bf16.mxu1 %v5706_v57  ;;  %v1928_v29 = vpop.f32.mrf.mxu1 }
 0x179   :  { %3254 = vmatmul.mubr.bf16.vlgmr.msra.gmra.mxu1 %v5708_v59  ;;  %v1929_v37 = vadd.f32 %v1928_v29, %v393_v5  ;;  %v5248_v29 = vld [vmem:[#allocation4 + $0x1cc] ss:$16 sps:$4 sm:$0xff]  }
 0x17a   :  { %3308 = vmatpush1.bf16.msra.mxu1 %v5243_v58  ;;  %3339 = vmatprep.mubr.bf16.mxu1 %v5552_v11  ;;  %v5216_v58 = vld [vmem:[#allocation4 + $0xe8] ss:$16 sps:$4 sm:$0xff]  }
 0x17b   :  { %3309 = vmatprep.subr.bf16.mxu1 %v5251_v60 }
 0x17e   :  { %3310 = vmatpush1.bf16.msra.mxu1 %v5249_v61  ;;  %v5221_v61 = vld [vmem:[#allocation4 + $0xcc] ss:$16 sps:$4 sm:$0xff]  }
 0x17f   :  { %3311 = vmatprep.subr.bf16.mxu1 %v5257_v62  ;;  %v5219_v62 = vld [vmem:[#allocation4 + $0xc8] ss:$16 sps:$4 sm:$0xff]  }
 0x182   :  { %3312 = vmatpush1.bf16.msra.mxu1 %v5255_v63  ;;  %v5224_v63 = vld [vmem:[#allocation4 + $0xac] ss:$16 sps:$4 sm:$0xff]  }
 0x183   :  { %3313 = vmatprep.subr.bf16.mxu1 %v5263_v0  ;;  %v5222_v0 = vld [vmem:[#allocation4 + $0xa8] ss:$16 sps:$4 sm:$0xff]  }
 0x186   :  { %3314 = vmatpush1.bf16.msra.mxu1 %v5261_v1  ;;  %v5227_v1 = vld [vmem:[#allocation4 + $0x8c] ss:$16 sps:$4 sm:$0xff]  }
 0x187   :  { %3315 = vmatprep.subr.bf16.mxu1 %v5269_v2  ;;  %v5225_v2 = vld [vmem:[#allocation4 + $0x88] ss:$16 sps:$4 sm:$0xff]  }
 0x18a   :  { %3316 = vmatpush1.bf16.msra.mxu1 %v5267_v3  ;;  %v5230_v3 = vld [vmem:[#allocation4 + $0x6c] ss:$16 sps:$4 sm:$0xff]  }
 0x18b   :  { %3317 = vmatprep.subr.bf16.mxu1 %v5275_v7  ;;  %v5228_v7 = vld [vmem:[#allocation4 + $0x68] ss:$16 sps:$4 sm:$0xff]  }
 0x18e   :  { %3318 = vmatpush1.bf16.msra.mxu1 %v5273_v8  ;;  %v5233_v8 = vld [vmem:[#allocation4 + $0x4c] ss:$16 sps:$4 sm:$0xff]  }
 0x18f   :  { %3319 = vmatprep.subr.bf16.mxu1 %v5281_v9 }
 0x192   :  { %3320 = vmatpush1.bf16.msra.mxu1 %v5279_v12  ;;  %v5231_v12 = vld [vmem:[#allocation4 + $0x48] ss:$16 sps:$4 sm:$0xff]  }
 0x193   :  { %3321 = vmatprep.subr.bf16.mxu1 %v5287_v16  ;;  %v5236_v16 = vld [vmem:[#allocation4 + $0x2c] ss:$16 sps:$4 sm:$0xff]  }
 0x196   :  { %3322 = vmatpush1.bf16.msra.mxu1 %v5285_v18 }
 0x197   :  { %3393 = vmatprep.subr.bf16.mxu1 %v5293_v19  ;;  %v5234_v19 = vld [vmem:[#allocation4 + $0x28] ss:$16 sps:$4 sm:$0xff]  }
 0x1a9   :  { %v1965_v24 = vpop.f32.mrf.mxu0 }
 0x1aa   :  { %v1966_v4 = vadd.f32 %v1965_v24, %v1923_v31  ;;  %v5246_v31 = vld [vmem:[#allocation4 + $0x1c8] ss:$16 sps:$4 sm:$0xff]  }
 0x1ab   :  { %v1967_v26 = vpop.f32.mrf.mxu0 }
 0x1ac   :  { %v1968_v34 = vadd.f32 %v1967_v26, %v1925_v30  ;;  %v5242_v26 = vld [vmem:[#allocation4 + $0x1ec] ss:$16 sps:$4 sm:$0xff]  }
 0x1ad   :  { %v1969_v28 = vpop.f32.mrf.mxu0 }
 0x1ae   :  { %v1970_v33 = vadd.f32 %v1969_v28, %v1927_v32  ;;  %v5240_v28 = vld [vmem:[#allocation4 + $0x1e8] ss:$16 sps:$4 sm:$0xff]  }
 0x1af   :  { %v1971_v50 = vpop.f32.mrf.mxu0  ;;  %v5252_v32 = vld [vmem:[#allocation4 + $0x1a8] ss:$16 sps:$4 sm:$0xff]  }
 0x1b0   :  { %v1972_v42 = vadd.f32 %v1971_v50, %v1929_v37  ;;  %v5266_v37 = vld [vmem:[#allocation4 + $0x16c] ss:$16 sps:$4 sm:$0xff]  }
 0x1b1   :  { %v2051_v14 = vpop.f32.mrf.mxu0 }
 0x1b2   :  { %v2008_v10 = vpop.f32.mrf.mxu1 }
 0x1b3   :  { %v2053_v36 = vpop.f32.mrf.mxu0  ;;  %v2009_v39 = vadd.f32 %v2008_v10, %v1966_v4  ;;  %v5254_v10 = vld [vmem:[#allocation4 + $0x1ac] ss:$16 sps:$4 sm:$0xff]   ;;  %v396_v4 = vsub.s32 4, %v5689_v6 }
 0x1b4   :  { %v2010_v35 = vpop.f32.mrf.mxu1 }
 0x1b5   :  { %v2011_v38 = vadd.f32 %v2010_v35, %v1968_v34  ;;  %v2055_v41 = vpop.f32.mrf.mxu0  ;;  %v2052_v49 = vadd.f32 %v2051_v14, %v2009_v39  ;;  %v5260_v34 = vld [vmem:[#allocation4 + $0x18c] ss:$16 sps:$4 sm:$0xff]  }
 0x1b6   :  { %v2012_v40 = vpop.f32.mrf.mxu1 }
 0x1b7   :  { %v2013_v43 = vadd.f32 %v2012_v40, %v1970_v33  ;;  %v2057_v45 = vpop.f32.mrf.mxu0  ;;  %v2054_v46 = vadd.f32 %v2053_v36, %v2011_v38  ;;  %v2226_v55 = vmax.f32 %v2052_v49, 0.0  ;;  %v5258_v36 = vld [vmem:[#allocation4 + $0x188] ss:$16 sps:$4 sm:$0xff]   ;;  %v397_v33 = vrot.slane %v5700_v17, %v396_v4  ;;  %v5329_v4 = vld [vmem:[#allocation4 + $0x22c] ss:$16 sps:$4 sm:$0xff]  }
 0x1b8   :  { %v2014_v44 = vpop.f32.mrf.mxu1  ;;  %v5264_v40 = vld [vmem:[#allocation4 + $0x168] ss:$16 sps:$4 sm:$0xff]  }
 0x1b9   :  { %v2056_v47 = vadd.f32 %v2055_v41, %v2013_v43  ;;  %v2015_v48 = vadd.f32 %v2014_v44, %v1972_v42  ;;  %v2227_v53 = vmax.f32 %v2054_v46, 0.0  ;;  %v5272_v41 = vld [vmem:[#allocation4 + $0x14c] ss:$16 sps:$4 sm:$0xff]   ;;  %v5270_v46 = vld [vmem:[#allocation4 + $0x148] ss:$16 sps:$4 sm:$0xff]  }
 0x1bb   :  { %v2058_v51 = vadd.f32 %v2057_v45, %v2015_v48  ;;  %v2231_v52 = vmax.f32 %v2056_v47, 0.0  ;;  %v5278_v48 = vld [vmem:[#allocation4 + $0x12c] ss:$16 sps:$4 sm:$0xff]  }
 0x1bd   :  { %v2232_v54 = vmax.f32 %v2058_v51, 0.0  ;;  %v5723_v60 = vpack.c.bf16 %v2231_v52, %v2226_v55  ;;  %v5276_v55 = vld [vmem:[#allocation4 + $0x128] ss:$16 sps:$4 sm:$0xff]  }
 0x1bf   :  { %v5721_v56 = vpack.c.bf16 %v2232_v54, %v2227_v53 }
 0x1c1   :  { %3296 = vmatprep.mubr.bf16.mxu0 %v5721_v56 }
 0x1c2   :  { %3297 = vmatmul.mubr.bf16.vlgmr.msra.gmra.mxu0 %v5723_v60 }
 0x1c3   :  { %3351 = vmatpush1.bf16.msra.mxu0 %v5216_v58  ;;  %3382 = vmatprep.mubr.bf16.mxu0 %v5706_v57 }
 0x1c4   :  { %3352 = vmatprep.subr.bf16.mxu0 %v5221_v61  ;;  %v5284_v61 = vld [vmem:[#allocation4 + $0x10c] ss:$16 sps:$4 sm:$0xff]  }
 0x1c7   :  { %3353 = vmatpush1.bf16.msra.mxu0 %v5219_v62 }
 0x1c8   :  { %3354 = vmatprep.subr.bf16.mxu0 %v5224_v63 }
 0x1cb   :  { %3355 = vmatpush1.bf16.msra.mxu0 %v5222_v0 }
 0x1cc   :  { %3356 = vmatprep.subr.bf16.mxu0 %v5227_v1 }
 0x1cf   :  { %3357 = vmatpush1.bf16.msra.mxu0 %v5225_v2  ;;  %v5282_v2 = vld [vmem:[#allocation4 + $0x108] ss:$16 sps:$4 sm:$0xff]  }
 0x1d0   :  { %3358 = vmatprep.subr.bf16.mxu0 %v5230_v3  ;;  %v5290_v3 = vld [vmem:[#allocation4 + $0x4ec] ss:$16 sps:$4 sm:$0xff]  }
 0x1d1   :  { %v4675_v30 = vpop.f32.mrf.mxu0 }
 0x1d2   :  { %v4697_v9 = vpop.f32.mrf.mxu1 }
 0x1d3   :  { %3359 = vmatpush1.bf16.msra.mxu0 %v5228_v7  ;;  %v4676_v14 = vpop.f32.mrf.mxu0 }
 0x1d4   :  { %3360 = vmatprep.subr.bf16.mxu0 %v5233_v8  ;;  %v4698_v57 = vpop.f32.mrf.mxu1  ;;  %v4677_v38 = vadd.f32 %v4676_v14, %v4675_v30  ;;  %v5312_v30 = vld [vmem:[#allocation4 + $0x468] ss:$16 sps:$4 sm:$0xff]  }
 0x1d5   :  { %v4678_v35 = vpop.f32.mrf.mxu0  ;;  %v4699_v43 = vadd.f32 %v4698_v57, %v4697_v9  ;;  %v5291_v57 = vld [vmem:[#allocation4 + $0x2e8] ss:$16 sps:$4 sm:$0xff]  }
 0x1d6   :  { %v4700_v18 = vpop.f32.mrf.mxu1  ;;  %v2095_v42 = vadd.f32 %v4677_v38, %v397_v33  ;;  %v5318_v14 = vld [vmem:[#allocation4 + $0x448] ss:$16 sps:$4 sm:$0xff]  }
 0x1d7   :  { %3361 = vmatpush1.bf16.msra.mxu0 %v5231_v12  ;;  %v4679_v39 = vpop.f32.mrf.mxu0  ;;  %v5288_v12 = vld [vmem:[#allocation4 + $0x4e8] ss:$16 sps:$4 sm:$0xff]  }
 0x1d8   :  { %3362 = vmatprep.subr.bf16.mxu0 %v5236_v16  ;;  %v4701_v20 = vpop.f32.mrf.mxu1  ;;  %v4680_v44 = vadd.f32 %v4679_v39, %v4678_v35  ;;  %v2136_v49 = vadd.f32 %v4699_v43, %v2095_v42  ;;  %v5324_v35 = vld [vmem:[#allocation4 + $0x428] ss:$16 sps:$4 sm:$0xff]   ;;  %v5341_v42 = vld [vmem:[#allocation4 + $0x3cc] ss:$16 sps:$4 sm:$0xff]  }
 0x1d9   :  { %v4702_v52 = vadd.f32 %v4701_v20, %v4700_v18  ;;  %v5296_v18 = vld [vmem:[#allocation4 + $0x4cc] ss:$16 sps:$4 sm:$0xff]   ;;  %v5294_v20 = vld [vmem:[#allocation4 + $0x4c8] ss:$16 sps:$4 sm:$0xff]  }
 0x1da   :  { %v2217_v24 = vpop.f32.mrf.mxu1  ;;  %v2098_v51 = vadd.f32 %v4680_v44, %v397_v33  ;;  %v5335_v33 = vld [vmem:[#allocation4 + $0x20c] ss:$16 sps:$4 sm:$0xff]   ;;  %v5330_v38 = vld [vmem:[#allocation4 + $0x408] ss:$16 sps:$4 sm:$0xff]  }
 0x1db   :  { %3363 = vmatpush1.bf16.msra.mxu0 %v5234_v19  ;;  %v5299_v19 = vld [vmem:[#allocation4 + $0x2cc] ss:$16 sps:$4 sm:$0xff]   ;;  %v5333_v39 = vld [vmem:[#allocation4 + $0x208] ss:$16 sps:$4 sm:$0xff]  }
 0x1dc   :  { %3364 = vmatprep.subr.bf16.mxu0 %v5239_v21  ;;  %v4753_v5 = vpop.f32.mrf.mxu1  ;;  %v2139_v62 = vadd.f32 %v4702_v52, %v2098_v51  ;;  %v5297_v21 = vld [vmem:[#allocation4 + $0x2c8] ss:$16 sps:$4 sm:$0xff]   ;;  %v5344_v44 = vld [vmem:[#allocation4 + $0x3ac] ss:$16 sps:$4 sm:$0xff]  }
 0x1dd   :  { %v5303_v5 = vld [vmem:[#allocation4 + $0x2a8] ss:$16 sps:$4 sm:$0xff]   ;;  %v5353_v51 = vld [vmem:[#allocation4 + $0x34c] ss:$16 sps:$4 sm:$0xff]  }
 0x1de   :  { %v2220_v27 = vpop.f32.mrf.mxu1  ;;  %v5339_v43 = vld [vmem:[#allocation4 + $0x3c8] ss:$16 sps:$4 sm:$0xff]  }
 0x1df   :  { %3365 = vmatpush1.bf16.msra.mxu0 %v5237_v25  ;;  %v5305_v25 = vld [vmem:[#allocation4 + $0x2ac] ss:$16 sps:$4 sm:$0xff]   ;;  %v5351_v52 = vld [vmem:[#allocation4 + $0x348] ss:$16 sps:$4 sm:$0xff]  }
 0x1e0   :  { %3366 = vmatprep.subr.bf16.mxu0 %v5242_v26  ;;  %v4754_v50 = vpop.f32.mrf.mxu1  ;;  %v5300_v26 = vld [vmem:[#allocation4 + $0x4a8] ss:$16 sps:$4 sm:$0xff]  }
 0x1e1   :  { %v5317_v50 = vld [vmem:[#allocation4 + $0x26c] ss:$16 sps:$4 sm:$0xff]  }
 0x1e3   :  { %3367 = vmatpush2.bf16.msra.mxu0 %v5240_v28  ;;  %v5306_v28 = vld [vmem:[#allocation4 + $0x488] ss:$16 sps:$4 sm:$0xff]  }
 0x1e4   :  { %3368 = vmatprep.subr.bf16.mxu0 %v5248_v29  ;;  %v5314_v29 = vld [vmem:[#allocation4 + $0x46c] ss:$16 sps:$4 sm:$0xff]  }
 0x1e7   :  { %3369 = vmatpush2.bf16.msra.mxu0 %v5246_v31  ;;  %v5320_v31 = vld [vmem:[#allocation4 + $0x44c] ss:$16 sps:$4 sm:$0xff]  }
 0x1e8   :  { %3370 = vmatprep.subr.bf16.mxu0 %v5254_v10  ;;  %v5323_v10 = vld [vmem:[#allocation4 + $0x24c] ss:$16 sps:$4 sm:$0xff]  }
 0x1eb   :  { %3371 = vmatpush2.bf16.msra.mxu0 %v5252_v32  ;;  %v5321_v32 = vld [vmem:[#allocation4 + $0x248] ss:$16 sps:$4 sm:$0xff]  }
 0x1ec   :  { %3372 = vmatprep.subr.bf16.mxu0 %v5260_v34  ;;  %v5326_v34 = vld [vmem:[#allocation4 + $0x42c] ss:$16 sps:$4 sm:$0xff]  }
 0x1ef   :  { %3373 = vmatpush2.bf16.msra.mxu0 %v5258_v36  ;;  %v5327_v36 = vld [vmem:[#allocation4 + $0x228] ss:$16 sps:$4 sm:$0xff]  }
 0x1f0   :  { %3374 = vmatprep.subr.bf16.mxu0 %v5266_v37  ;;  %v5332_v37 = vld [vmem:[#allocation4 + $0x40c] ss:$16 sps:$4 sm:$0xff]  }
 0x1f1   :  { %v4719_v45 = vpop.f32.mrf.mxu0 }
 0x1f3   :  { %3375 = vmatpush2.bf16.msra.mxu0 %v5264_v40  ;;  %v4720_v47 = vpop.f32.mrf.mxu0  ;;  %v5338_v40 = vld [vmem:[#allocation4 + $0x3ec] ss:$16 sps:$4 sm:$0xff]  }
 0x1f4   :  { %3376 = vmatprep.subr.bf16.mxu0 %v5272_v41  ;;  %v4721_v53 = vadd.f32 %v4720_v47, %v4719_v45  ;;  %v5336_v41 = vld [vmem:[#allocation4 + $0x3e8] ss:$16 sps:$4 sm:$0xff]  }
 0x1f5   :  { %v4722_v17 = vpop.f32.mrf.mxu0  ;;  %v5342_v45 = vld [vmem:[#allocation4 + $0x3a8] ss:$16 sps:$4 sm:$0xff]  }
 0x1f6   :  { %v2177_v54 = vadd.f32 %v4721_v53, %v2136_v49  ;;  %v5345_v47 = vld [vmem:[#allocation4 + $0x388] ss:$16 sps:$4 sm:$0xff]   ;;  %v5356_v53 = vld [vmem:[#allocation4 + $0x32c] ss:$16 sps:$4 sm:$0xff]  }
 0x1f7   :  { %3377 = vmatpush2.bf16.msra.mxu0 %v5270_v46  ;;  %v4723_v58 = vpop.f32.mrf.mxu0  ;;  %v5347_v46 = vld [vmem:[#allocation4 + $0x38c] ss:$16 sps:$4 sm:$0xff]   ;;  %v5348_v49 = vld [vmem:[#allocation4 + $0x368] ss:$16 sps:$4 sm:$0xff]  }
 0x1f8   :  { %3378 = vmatprep.subr.bf16.mxu0 %v5278_v48  ;;  %v4724_v63 = vadd.f32 %v4723_v58, %v4722_v17  ;;  %v2218_v0 = vadd.f32 %v2217_v24, %v2177_v54  ;;  %v5302_v24 = vld [vmem:[#allocation4 + $0x4ac] ss:$16 sps:$4 sm:$0xff]   ;;  %v5354_v17 = vld [vmem:[#allocation4 + $0x328] ss:$16 sps:$4 sm:$0xff]  }
 0x1f9   :  { %v5350_v48 = vld [vmem:[#allocation4 + $0x36c] ss:$16 sps:$4 sm:$0xff]  }
 0x1fa   :  { %v2180_v1 = vadd.f32 %v4724_v63, %v2139_v62  ;;  %v2228_v8 = vmax.f32 %v2218_v0, 0.0  ;;  %v5359_v54 = vld [vmem:[#allocation4 + $0x30c] ss:$16 sps:$4 sm:$0xff]   ;;  %v5363_v63 = vld [vmem:[%s5958_s5 + $0x60] ss:$8 sps:$4 sm:$0xff]  }
 0x1fb   :  { %3379 = vmatpush2.bf16.msra.mxu0 %v5276_v55  ;;  %v5357_v55 = vld [vmem:[#allocation4 + $0x308] ss:$16 sps:$4 sm:$0xff]   ;;  %v5362_v58 = vld [vmem:[%s5958_s5 + $0x74] ss:$8 sps:$4 sm:$0xff]   ;;  %v5365_v62 = vld [vmem:[%s5958_s5 + $0x64] ss:$8 sps:$4 sm:$0xff]  }
 0x1fc   :  { %3380 = vmatprep.subr.bf16.mxu0 %v5284_v61  ;;  %v2221_v7 = vadd.f32 %v2220_v27, %v2180_v1  ;;  %v5311_v27 = vld [vmem:[#allocation4 + $0x28c] ss:$16 sps:$4 sm:$0xff]   ;;  %v5360_v61 = vld [vmem:[%s5958_s5 + $0x70] ss:$8 sps:$4 sm:$0xff]  }
 0x1fd   :  { %v5368_v0 = vld [vmem:[%s5958_s5 + $0x54] ss:$8 sps:$4 sm:$0xff]   ;;  %v5366_v1 = vld [vmem:[%s5958_s5 + $0x50] ss:$8 sps:$4 sm:$0xff]  }
 0x1fe   :  { %v2233_v9 = vmax.f32 %v2221_v7, 0.0  ;;  %v5372_v7 = vld [vmem:[%s5958_s5 + $0x30] ss:$8 sps:$4 sm:$0xff]  }
 0x1ff   :  { %3381 = vmatpush2.bf16.msra.mxu0 %v5282_v2  ;;  %v5369_v2 = vld [vmem:[%s5958_s5 + $0x40] ss:$8 sps:$4 sm:$0xff]  }
 0x200   :  { %3436 = vmatprep.subr.bf16.mxu0 %v5290_v3  ;;  %v5730_v16 = vpack.c.bf16 %v2233_v9, %v2228_v8  ;;  %v5374_v3 = vld [vmem:[%s5958_s5 + $0x34] ss:$8 sps:$4 sm:$0xff]   ;;  %v5377_v8 = vld [vmem:[%s5958_s5 + $0x24] ss:$8 sps:$4 sm:$0xff]   ;;  %v5408_v9 = vld [vmem:[%s5958_s5 + $0x170] ss:$8 sps:$4 sm:$0xff]  }
 0x202   :  { %3383 = vmatmul.mubr.bf16.vlgmr.msra.gmra.mxu0 %v5708_v59  ;;  %3340 = vmatmul.mubr.bf16.vlgmr.msra.gmra.mxu1 %v5730_v16  ;;  %v5308_v59 = vld [vmem:[#allocation4 + $0x48c] ss:$16 sps:$4 sm:$0xff]  }
 0x203   :  { %3437 = vmatpush1.bf16.msra.mxu0 %v5288_v12  ;;  %3394 = vmatpush1.bf16.msra.mxu1 %v5291_v57  ;;  %v5410_v12 = vld [vmem:[%s5958_s5 + $0x174] ss:$8 sps:$4 sm:$0xff]   ;;  %v5413_v57 = vld [vmem:[%s5958_s5 + $0x164] ss:$8 sps:$4 sm:$0xff]  }
 0x204   :  { %3425 = vmatprep.mubr.bf16.mxu1 %v5721_v56  ;;  %3438 = vmatprep.subr.bf16.mxu0 %v5296_v18  ;;  %v5309_v56 = vld [vmem:[#allocation4 + $0x288] ss:$16 sps:$4 sm:$0xff]  }
 0x205   :  { %3395 = vmatprep.subr.bf16.mxu1 %v5299_v19  ;;  %3468 = vmatprep.mubr.bf16.mxu0 %v5552_v11  ;;  %v5315_v11 = vld [vmem:[#allocation4 + $0x268] ss:$16 sps:$4 sm:$0xff]   ;;  %v5380_v19 = vld [vmem:[%s5958_s5 + $0x14] ss:$8 sps:$4 sm:$0xff]  }
 0x206   :  { %v5411_v18 = vld [vmem:[%s5958_s5 + $0x160] ss:$8 sps:$4 sm:$0xff]  }
 0x207   :  { %3439 = vmatpush1.bf16.msra.mxu0 %v5294_v20  ;;  %3396 = vmatpush1.bf16.msra.mxu1 %v5297_v21  ;;  %v5416_v20 = vld [vmem:[%s5958_s5 + $0x154] ss:$8 sps:$4 sm:$0xff]   ;;  %v5378_v21 = vld [vmem:[%s5958_s5 + $0x10] ss:$8 sps:$4 sm:$0xff]  }
 0x208   :  { %3440 = vmatprep.subr.bf16.mxu0 %v5302_v24  ;;  %3397 = vmatprep.subr.bf16.mxu1 %v5305_v25  ;;  %v5414_v24 = vld [vmem:[%s5958_s5 + $0x150] ss:$8 sps:$4 sm:$0xff]   ;;  %v5383_v25 = vld [vmem:[%s5958_s5 + $0x4] ss:$8 sps:$4 sm:$0xff]  }
 0x20b   :  { %3441 = vmatpush1.bf16.msra.mxu0 %v5300_v26  ;;  %3398 = vmatpush1.bf16.msra.mxu1 %v5303_v5  ;;  %v5419_v26 = vld [vmem:[%s5958_s5 + $0x144] ss:$8 sps:$4 sm:$0xff]   ;;  %v5381_v5 = vld [vmem:[%s5958_s5] ss:$8 sps:$4 sm:$0xff]  }
 0x20c   :  { %3442 = vmatprep.subr.bf16.mxu0 %v5308_v59  ;;  %3399 = vmatprep.subr.bf16.mxu1 %v5311_v27  ;;  %v5417_v59 = vld [vmem:[%s5958_s5 + $0x140] ss:$8 sps:$4 sm:$0xff]   ;;  %v5386_v27 = vld [vmem:[%s5958_s5 + $0xf4] ss:$8 sps:$4 sm:$0xff]  }
 0x20f   :  { %3443 = vmatpush1.bf16.msra.mxu0 %v5306_v28  ;;  %3400 = vmatpush1.bf16.msra.mxu1 %v5309_v56  ;;  %v5384_v28 = vld [vmem:[%s5958_s5 + $0xf0] ss:$8 sps:$4 sm:$0xff]   ;;  %v5389_v56 = vld [vmem:[%s5958_s5 + $0xe4] ss:$8 sps:$4 sm:$0xff]  }
 0x210   :  { %3444 = vmatprep.subr.bf16.mxu0 %v5314_v29  ;;  %3401 = vmatprep.subr.bf16.mxu1 %v5317_v50  ;;  %v5422_v29 = vld [vmem:[%s5958_s5 + $0x134] ss:$8 sps:$4 sm:$0xff]   ;;  %v5420_v50 = vld [vmem:[%s5958_s5 + $0x130] ss:$8 sps:$4 sm:$0xff]  }
 0x213   :  { %3445 = vmatpush1.bf16.msra.mxu0 %v5312_v30  ;;  %3402 = vmatpush1.bf16.msra.mxu1 %v5315_v11  ;;  %v5387_v30 = vld [vmem:[%s5958_s5 + $0xe0] ss:$8 sps:$4 sm:$0xff]   ;;  %v5392_v11 = vld [vmem:[%s5958_s5 + $0xd4] ss:$8 sps:$4 sm:$0xff]  }
 0x214   :  { %3446 = vmatprep.subr.bf16.mxu0 %v5320_v31  ;;  %3403 = vmatprep.subr.bf16.mxu1 %v5323_v10  ;;  %v5425_v31 = vld [vmem:[%s5958_s5 + $0x124] ss:$8 sps:$4 sm:$0xff]   ;;  %v5423_v10 = vld [vmem:[%s5958_s5 + $0x120] ss:$8 sps:$4 sm:$0xff]  }
 0x217   :  { %3447 = vmatpush1.bf16.msra.mxu0 %v5318_v14  ;;  %3404 = vmatpush1.bf16.msra.mxu1 %v5321_v32  ;;  %v5390_v14 = vld [vmem:[%s5958_s5 + $0xd0] ss:$8 sps:$4 sm:$0xff]  }
 0x218   :  { %3448 = vmatprep.subr.bf16.mxu0 %v5326_v34  ;;  %3405 = vmatprep.subr.bf16.mxu1 %v5329_v4  ;;  %v5426_v32 = vld [vmem:[%s5958_s5 + $0x110] ss:$8 sps:$4 sm:$0xff]   ;;  %v5428_v34 = vld [vmem:[%s5958_s5 + $0x114] ss:$8 sps:$4 sm:$0xff]   ;;  %v5395_v4 = vld [vmem:[%s5958_s5 + $0xc4] ss:$8 sps:$4 sm:$0xff]  }
 0x21b   :  { %3449 = vmatpush1.bf16.msra.mxu0 %v5324_v35  ;;  %3406 = vmatpush1.bf16.msra.mxu1 %v5327_v36  ;;  %v5431_v35 = vld [vmem:[%s5958_s5 + $0x104] ss:$8 sps:$4 sm:$0xff]   ;;  %v5393_v36 = vld [vmem:[%s5958_s5 + $0xc0] ss:$8 sps:$4 sm:$0xff]  }
 0x21c   :  { %3450 = vmatprep.subr.bf16.mxu0 %v5332_v37  ;;  %3407 = vmatprep.subr.bf16.mxu1 %v5335_v33  ;;  %v5429_v37 = vld [vmem:[%s5958_s5 + $0x100] ss:$8 sps:$4 sm:$0xff]   ;;  %v5398_v33 = vld [vmem:[%s5958_s5 + $0xb4] ss:$8 sps:$4 sm:$0xff]  }
 0x21f   :  { %3451 = vmatpush1.bf16.msra.mxu0 %v5330_v38  ;;  %3408 = vmatpush1.bf16.msra.mxu1 %v5333_v39  ;;  %v5434_v38 = vld [vmem:[%s5958_s5 + $0x1f4] ss:$8 sps:$4 sm:$0xff]   ;;  %v5396_v39 = vld [vmem:[%s5958_s5 + $0xb0] ss:$8 sps:$4 sm:$0xff]  }
 0x220   :  { %3409 = vmatprep.subr.bf16.mxu1 %v5338_v40  ;;  %3930 = vmatprep.subr.bf16.mxu0 %v5410_v12  ;;  %v5432_v40 = vld [vmem:[%s5958_s5 + $0x1f0] ss:$8 sps:$4 sm:$0xff]  }
 0x222   :  { %3469 = vmatmul.mubr.bf16.vlgmr.msra.gmra.mxu0 %v5730_v16  ;;  %v5375_v16 = vld [vmem:[%s5958_s5 + $0x20] ss:$8 sps:$4 sm:$0xff]  }
 0x223   :  { %3410 = vmatpush2.bf16.msra.mxu1 %v5336_v41  ;;  %3931 = vmatpush1.bf16.msra.mxu0 %v5408_v9  ;;  %v5401_v41 = vld [vmem:[%s5958_s5 + $0xa4] ss:$8 sps:$4 sm:$0xff]  }
 0x224   :  { %3411 = vmatprep.subr.bf16.mxu1 %v5341_v42  ;;  %3932 = vmatprep.subr.bf16.mxu0 %v5413_v57  ;;  %v5437_v42 = vld [vmem:[%s5958_s5 + $0x1e4] ss:$8 sps:$4 sm:$0xff]  }
 0x227   :  { %3412 = vmatpush2.bf16.msra.mxu1 %v5339_v43  ;;  %3933 = vmatpush1.bf16.msra.mxu0 %v5411_v18  ;;  %v5399_v43 = vld [vmem:[%s5958_s5 + $0xa0] ss:$8 sps:$4 sm:$0xff]  }
 0x228   :  { %3413 = vmatprep.subr.bf16.mxu1 %v5344_v44  ;;  %3934 = vmatprep.subr.bf16.mxu0 %v5416_v20  ;;  %v5435_v44 = vld [vmem:[%s5958_s5 + $0x1e0] ss:$8 sps:$4 sm:$0xff]  }
 0x22b   :  { %3414 = vmatpush2.bf16.msra.mxu1 %v5342_v45  ;;  %3935 = vmatpush1.bf16.msra.mxu0 %v5414_v24  ;;  %v5404_v45 = vld [vmem:[%s5958_s5 + $0x94] ss:$8 sps:$4 sm:$0xff]  }
 0x22c   :  { %3415 = vmatprep.subr.bf16.mxu1 %v5347_v46  ;;  %3936 = vmatprep.subr.bf16.mxu0 %v5419_v26  ;;  %v5440_v46 = vld [vmem:[%s5958_s5 + $0x1d4] ss:$8 sps:$4 sm:$0xff]  }
 0x22f   :  { %3416 = vmatpush2.bf16.msra.mxu1 %v5345_v47  ;;  %3937 = vmatpush1.bf16.msra.mxu0 %v5417_v59  ;;  %v5402_v47 = vld [vmem:[%s5958_s5 + $0x90] ss:$8 sps:$4 sm:$0xff]  }
 0x230   :  { %3417 = vmatprep.subr.bf16.mxu1 %v5350_v48  ;;  %3938 = vmatprep.subr.bf16.mxu0 %v5422_v29  ;;  %v5438_v48 = vld [vmem:[%s5958_s5 + $0x1d0] ss:$8 sps:$4 sm:$0xff]  }
 0x233   :  { %3418 = vmatpush2.bf16.msra.mxu1 %v5348_v49  ;;  %3939 = vmatpush1.bf16.msra.mxu0 %v5420_v50  ;;  %v5407_v49 = vld [vmem:[%s5958_s5 + $0x84] ss:$8 sps:$4 sm:$0xff]  }
 0x234   :  { %3419 = vmatprep.subr.bf16.mxu1 %v5353_v51  ;;  %3940 = vmatprep.subr.bf16.mxu0 %v5425_v31  ;;  %v5443_v51 = vld [vmem:[%s5958_s5 + $0x1c4] ss:$8 sps:$4 sm:$0xff]  }
 0x237   :  { %3420 = vmatpush2.bf16.msra.mxu1 %v5351_v52  ;;  %3941 = vmatpush1.bf16.msra.mxu0 %v5423_v10  ;;  %v5405_v52 = vld [vmem:[%s5958_s5 + $0x80] ss:$8 sps:$4 sm:$0xff]  }
 0x238   :  { %3421 = vmatprep.subr.bf16.mxu1 %v5356_v53  ;;  %3942 = vmatprep.subr.bf16.mxu0 %v5428_v34  ;;  %v5441_v53 = vld [vmem:[%s5958_s5 + $0x1c0] ss:$8 sps:$4 sm:$0xff]  }
 0x23b   :  { %3422 = vmatpush2.bf16.msra.mxu1 %v5354_v17  ;;  %3943 = vmatpush1.bf16.msra.mxu0 %v5426_v32  ;;  %v5446_v17 = vld [vmem:[%s5958_s5 + $0x1b4] ss:$8 sps:$4 sm:$0xff]  }
 0x23c   :  { %3423 = vmatprep.subr.bf16.mxu1 %v5359_v54  ;;  %3944 = vmatprep.subr.bf16.mxu0 %v5431_v35  ;;  %v5444_v54 = vld [vmem:[%s5958_s5 + $0x1b0] ss:$8 sps:$4 sm:$0xff]  }
 0x23f   :  { %3424 = vmatpush2.bf16.msra.mxu1 %v5357_v55  ;;  %3945 = vmatpush1.bf16.msra.mxu0 %v5429_v37  ;;  %v5449_v55 = vld [vmem:[%s5958_s5 + $0x1a4] ss:$8 sps:$4 sm:$0xff]  }
 0x240   :  { %3887 = vmatprep.subr.bf16.mxu1 %v5362_v58  ;;  %3946 = vmatprep.subr.bf16.mxu0 %v5434_v38  ;;  %v5447_v58 = vld [vmem:[%s5958_s5 + $0x1a0] ss:$8 sps:$4 sm:$0xff]  }
 0x242   :  { %3426 = vmatmul.mubr.bf16.vlgmr.msra.gmra.mxu1 %v5723_v60  ;;  %v5371_v60 = vld [vmem:[%s5958_s5 + $0x44] ss:$8 sps:$4 sm:$0xff]  }
 0x243   :  { %3888 = vmatpush1.bf16.msra.mxu1 %v5360_v61  ;;  %3947 = vmatpush2.bf16.msra.mxu0 %v5432_v40  ;;  %v5452_v61 = vld [vmem:[%s5958_s5 + $0x194] ss:$8 sps:$4 sm:$0xff]  }
 0x244   :  { %3889 = vmatprep.subr.bf16.mxu1 %v5365_v62  ;;  %3948 = vmatprep.subr.bf16.mxu0 %v5437_v42  ;;  %v5450_v62 = vld [vmem:[%s5958_s5 + $0x190] ss:$8 sps:$4 sm:$0xff]  }
 0x247   :  { %3890 = vmatpush1.bf16.msra.mxu1 %v5363_v63  ;;  %3949 = vmatpush2.bf16.msra.mxu0 %v5435_v44  ;;  %v5455_v63 = vld [vmem:[%s5958_s5 + $0x184] ss:$8 sps:$4 sm:$0xff]  }
 0x248   :  { %3891 = vmatprep.subr.bf16.mxu1 %v5368_v0  ;;  %3950 = vmatprep.subr.bf16.mxu0 %v5440_v46  ;;  %v5453_v0 = vld [vmem:[%s5958_s5 + $0x180] ss:$8 sps:$4 sm:$0xff]  }
 0x24b   :  { %3892 = vmatpush1.bf16.msra.mxu1 %v5366_v1  ;;  %3951 = vmatpush2.bf16.msra.mxu0 %v5438_v48  ;;  %v3255_v1 = vpop.f32.mrf.mxu1 }
 0x24c   :  { %3893 = vmatprep.subr.bf16.mxu1 %v5371_v60  ;;  %3952 = vmatprep.subr.bf16.mxu0 %v5443_v51 }
 0x24d   :  { %v3257_v60 = vpop.f32.mrf.mxu1 }
 0x24f   :  { %3894 = vmatpush1.bf16.msra.mxu1 %v5369_v2  ;;  %3953 = vmatpush2.bf16.msra.mxu0 %v5441_v53 }
 0x250   :  { %3895 = vmatprep.subr.bf16.mxu1 %v5374_v3  ;;  %3954 = vmatprep.subr.bf16.mxu0 %v5446_v17  ;;  %v3259_v3 = vpop.f32.mrf.mxu1 }
 0x252   :  { %v3261_v57 = vpop.f32.mrf.mxu1 }
 0x253   :  { %3896 = vmatpush1.bf16.msra.mxu1 %v5372_v7  ;;  %3955 = vmatpush2.bf16.msra.mxu0 %v5444_v54 }
 0x254   :  { %3897 = vmatprep.subr.bf16.mxu1 %v5377_v8  ;;  %3956 = vmatprep.subr.bf16.mxu0 %v5449_v55  ;;  %v2399_v8 = vld [vmem:[%s5957_s4] sm:$0xf] }
 0x255   :  { %v2408_v9 = vrot.slane %v2399_v8, %v5695_v15  ;;  %v2404_v12 = vrot.slane %v2399_v8, %v5692_v13  ;;  %v2416_v40 = vrot.slane %v2399_v8, %v392_v22 }
 0x257   :  { %3898 = vmatpush1.bf16.msra.mxu1 %v5375_v16  ;;  %3957 = vmatpush2.bf16.msra.mxu0 %v5447_v58  ;;  %v3260_v20 = vadd.f32 %v3259_v3, %v2404_v12  ;;  %v3262_v26 = vadd.f32 %v3261_v57, %v2408_v9  ;;  %v5456_v3 = vld [vmem:[#allocation6 + $0x78] sm:$0xff]   ;;  %v5461_v57 = vld [vmem:[#allocation6 + $0x28] sm:$0xff]  }
 0x258   :  { %3899 = vmatprep.subr.bf16.mxu1 %v5380_v19  ;;  %3958 = vmatprep.subr.bf16.mxu0 %v5452_v61  ;;  %v3258_v19 = vadd.f32 %v3257_v60, %v2408_v9  ;;  %v5459_v9 = vld [vmem:[#allocation6 + $0x30] sm:$0xff]  }
 0x25b   :  { %3900 = vmatpush1.bf16.msra.mxu1 %v5378_v21  ;;  %3959 = vmatpush2.bf16.msra.mxu0 %v5450_v62  ;;  %v3256_v21 = vadd.f32 %v3255_v1, %v2404_v12  ;;  %v5460_v12 = vld [vmem:[#allocation6 + $0x68] sm:$0xff]  }
 0x25c   :  { %3901 = vmatprep.subr.bf16.mxu1 %v5383_v25  ;;  %3960 = vmatprep.subr.bf16.mxu0 %v5455_v63 }
 0x25f   :  { %3902 = vmatpush1.bf16.msra.mxu1 %v5381_v5  ;;  %3961 = vmatpush2.bf16.msra.mxu0 %v5453_v0 }
 0x260   :  { %3903 = vmatprep.subr.bf16.mxu1 %v5386_v27 }
 0x263   :  { %3904 = vmatpush2.bf16.msra.mxu1 %v5384_v28 }
 0x264   :  { %3905 = vmatprep.subr.bf16.mxu1 %v5389_v56 }
 0x267   :  { %3906 = vmatpush2.bf16.msra.mxu1 %v5387_v30 }
 0x268   :  { %3907 = vmatprep.subr.bf16.mxu1 %v5392_v11 }
 0x26b   :  { %3908 = vmatpush2.bf16.msra.mxu1 %v5390_v14 }
 0x26c   :  { %3909 = vmatprep.subr.bf16.mxu1 %v5395_v4 }
 0x26f   :  { %3910 = vmatpush2.bf16.msra.mxu1 %v5393_v36 }
 0x270   :  { %3911 = vmatprep.subr.bf16.mxu1 %v5398_v33 }
 0x273   :  { %3912 = vmatpush2.bf16.msra.mxu1 %v5396_v39 }
 0x274   :  { %3913 = vmatprep.subr.bf16.mxu1 %v5401_v41  ;;  %v2412_v41 = vrot.slane %v2399_v8, %v388_v23  ;;  %v5458_v8 = vld [vmem:[#allocation6 + $0x70] sm:$0xff]  }
 0x277   :  { %3914 = vmatpush2.bf16.msra.mxu1 %v5399_v43 }
 0x278   :  { %3915 = vmatprep.subr.bf16.mxu1 %v5404_v45 }
 0x27b   :  { %3916 = vmatpush2.bf16.msra.mxu1 %v5402_v47 }
 0x27c   :  { %3917 = vmatprep.subr.bf16.mxu1 %v5407_v49 }
 0x27f   :  { %3918 = vmatpush2.bf16.msra.mxu1 %v5405_v52 }
 0x280   :  { %4727 = vmatprep.subr.bf16.mxu1 %v5456_v3 }
 0x282   :  { %v3298_v2 = vpop.f32.mrf.mxu0 }
 0x283   :  { %v3299_v27 = vadd.f32 %v3298_v2, %v3256_v21  ;;  %v5466_v21 = vld [vmem:[#allocation6 + $0x50] sm:$0xff]  }
 0x284   :  { %v3300_v7 = vpop.f32.mrf.mxu0 }
 0x285   :  { %v3301_v5 = vadd.f32 %v3300_v7, %v3258_v19  ;;  %v5457_v7 = vld [vmem:[#allocation6 + $0x38] sm:$0xff]  }
 0x286   :  { %v3302_v16 = vpop.f32.mrf.mxu0  ;;  %v5464_v19 = vld [vmem:[#allocation6 + $0x58] sm:$0xff]  }
 0x287   :  { %v3303_v59 = vadd.f32 %v3302_v16, %v3260_v20  ;;  %v5462_v16 = vld [vmem:[#allocation6 + $0x60] sm:$0xff]   ;;  %v5465_v20 = vld [vmem:[#allocation6 + $0x18] sm:$0xff]  }
 0x288   :  { %v3304_v24 = vpop.f32.mrf.mxu0 }
 0x289   :  { %v3305_v56 = vadd.f32 %v3304_v24, %v3262_v26  ;;  %v5467_v24 = vld [vmem:[#allocation6 + $0x10] sm:$0xff]   ;;  %v5469_v26 = vld [vmem:[#allocation6 + $0x8] sm:$0xff]  }
 0x2c2   :  { %v3341_v18 = vpop.f32.mrf.mxu1  ;;  %v3384_v36 = vpop.f32.mrf.mxu0 }
 0x2c3   :  { %v3342_v30 = vadd.f32 %v3341_v18, %v3299_v27  ;;  %v3385_v45 = vadd.f32 %v3384_v36, %v2412_v41  ;;  %v5463_v18 = vld [vmem:[#allocation6 + $0x20] sm:$0xff]  }
 0x2c4   :  { %v3343_v25 = vpop.f32.mrf.mxu1  ;;  %v3386_v37 = vpop.f32.mrf.mxu0 }
 0x2c5   :  { %v3344_v29 = vadd.f32 %v3343_v25, %v3301_v5  ;;  %v3479_v34 = vmax.f32 %v3342_v30, 0.0  ;;  %v3387_v44 = vadd.f32 %v3386_v37, %v2416_v40  ;;  %v5468_v25 = vld [vmem:[#allocation6 + $0x48] sm:$0xff]   ;;  %v5470_v5 = vld [vmem:[#allocation6 + $0x40] sm:$0xff]  }
 0x2c6   :  { %v3345_v28 = vpop.f32.mrf.mxu1  ;;  %v3388_v33 = vpop.f32.mrf.mxu0 }
 0x2c7   :  { %v3346_v50 = vadd.f32 %v3345_v28, %v3303_v59  ;;  %v3480_v14 = vmax.f32 %v3344_v29, 0.0  ;;  %v3389_v47 = vadd.f32 %v3388_v33, %v2412_v41  ;;  %v5471_v59 = vld [vmem:[#allocation6] sm:$0xff]  }
 0x2c8   :  { %v3347_v11 = vpop.f32.mrf.mxu1  ;;  %v3390_v38 = vpop.f32.mrf.mxu0 }
 0x2c9   :  { %v3348_v31 = vadd.f32 %v3347_v11, %v3305_v56  ;;  %v3483_v10 = vmax.f32 %v3346_v50, 0.0  ;;  %v3391_v53 = vadd.f32 %v3390_v38, %v2416_v40  ;;  %v3555_v56 = vld [vmem:[%s5959_s6] sm:$0x3] }
 0x2ca   :  { %v3564_v50 = vrot.slane %v3555_v56, %v5695_v15  ;;  %v3560_v30 = vrot.slane %v3555_v56, %v5692_v13 }
 0x2cb   :  { %v3484_v32 = vmax.f32 %v3348_v31, 0.0  ;;  %v3487_v35 = vpack.c.bf16 %v3483_v10, %v3479_v34 }
 0x2cd   :  { %v3488_v4 = vpack.c.bf16 %v3484_v32, %v3480_v14 }
 0x2cf   :  { %3919 = vmatprep.mubr.bf16.mxu1 %v3488_v4 }
 0x2d0   :  { %3920 = vmatmul.mubr.bf16.vlgmr.msra.gmra.mxu1 %v3487_v35 }
 0x2d1   :  { %4728 = vmatpush3.bf16.msra.mxu1 %v5457_v7 }
 0x2d2   :  { %4729 = vmatprep.subr.bf16.mxu1 %v5458_v8 }
 0x2d5   :  { %4730 = vmatpush3.bf16.msra.mxu1 %v5459_v9 }
 0x2d6   :  { %4731 = vmatprep.subr.bf16.mxu1 %v5460_v12 }
 0x2d9   :  { %4732 = vmatpush3.bf16.msra.mxu1 %v5461_v57 }
 0x2da   :  { %4733 = vmatprep.subr.bf16.mxu1 %v5462_v16 }
 0x2dd   :  { %4734 = vmatpush3.bf16.msra.mxu1 %v5463_v18 }
 0x2de   :  { %4735 = vmatprep.subr.bf16.mxu1 %v5464_v19 }
 0x2e1   :  { %4736 = vmatpush3.bf16.msra.mxu1 %v5465_v20 }
 0x2e2   :  { %v3470_v39 = vpop.f32.mrf.mxu0  ;;  %4737 = vmatprep.subr.bf16.mxu1 %v5466_v21 }
 0x2e4   :  { %v3472_v42 = vpop.f32.mrf.mxu0 }
 0x2e5   :  { %4738 = vmatpush3.bf16.msra.mxu1 %v5467_v24 }
 0x2e6   :  { %v3474_v49 = vpop.f32.mrf.mxu0  ;;  %4739 = vmatprep.subr.bf16.mxu1 %v5468_v25 }
 0x2e8   :  { %v3476_v22 = vpop.f32.mrf.mxu0 }
 0x2e9   :  { %4740 = vmatpush3.bf16.msra.mxu1 %v5469_v26 }
 0x2ea   :  { %4741 = vmatprep.subr.bf16.mxu1 %v5470_v5 }
 0x2ed   :  { %4742 = vmatpush3.bf16.msra.mxu1 %v5471_v59 }
 0x302   :  { %v3427_v43 = vpop.f32.mrf.mxu1 }
 0x303   :  { %v3428_v51 = vadd.f32 %v3427_v43, %v3385_v45  ;;  %v4642_v45 = vld [vmem:[%s5961_s8] ss:$0 sm:$0xff] }
 0x304   :  { %v3429_v46 = vpop.f32.mrf.mxu1 }
 0x305   :  { %v3430_v48 = vadd.f32 %v3429_v46, %v3387_v44  ;;  %v3471_v62 = vadd.f32 %v3470_v39, %v3428_v51 }
 0x306   :  { %v3431_v52 = vpop.f32.mrf.mxu1 }
 0x307   :  { %v3432_v17 = vadd.f32 %v3431_v52, %v3389_v47  ;;  %v3473_v55 = vadd.f32 %v3472_v42, %v3430_v48  ;;  %v3481_v1 = vmax.f32 %v3471_v62, 0.0 }
 0x308   :  { %v3433_v54 = vpop.f32.mrf.mxu1 }
 0x309   :  { %v3475_v58 = vadd.f32 %v3474_v49, %v3432_v17  ;;  %v3434_v61 = vadd.f32 %v3433_v54, %v3391_v53  ;;  %v3482_v63 = vmax.f32 %v3473_v55, 0.0 }
 0x30b   :  { %v3477_v6 = vadd.f32 %v3476_v22, %v3434_v61  ;;  %v3485_v23 = vmax.f32 %v3475_v58, 0.0 }
 0x30d   :  { %v3486_v0 = vmax.f32 %v3477_v6, 0.0  ;;  %v3489_v2 = vpack.c.bf16 %v3485_v23, %v3481_v1 }
 0x30f   :  { %v3490_v60 = vpack.c.bf16 %v3486_v0, %v3482_v63 }
 0x311   :  { %3962 = vmatprep.mubr.bf16.mxu0 %v3490_v60 }
 0x312   :  { %3963 = vmatmul.mubr.bf16.vlgmr.msra.gmra.mxu0 %v3489_v2 }
 0x390   :  { %v3921_v27 = vpop.f32.mrf.mxu1 }
 0x391   :  { %v3922_v34 = vadd.f32 %v3921_v27, %v3560_v30 }
 0x392   :  { %v3923_v28 = vpop.f32.mrf.mxu1 }
 0x393   :  { %v3924_v14 = vadd.f32 %v3923_v28, %v3564_v50 }
 0x394   :  { %v3925_v29 = vpop.f32.mrf.mxu1 }
 0x395   :  { %v3926_v32 = vadd.f32 %v3925_v29, %v3560_v30 }
 0x396   :  { %v3927_v31 = vpop.f32.mrf.mxu1 }
 0x397   :  { %v3928_v35 = vadd.f32 %v3927_v31, %v3564_v50 }
 0x3d2   :  { %v3964_v11 = vpop.f32.mrf.mxu0 }
 0x3d3   :  { %v3965_v33 = vadd.f32 %v3964_v11, %v3922_v34 }
 0x3d4   :  { %v3966_v10 = vpop.f32.mrf.mxu0 }
 0x3d5   :  { %v3967_v36 = vadd.f32 %v3966_v10, %v3924_v14  ;;  %v3973_v43 = vmax.f32 %v3965_v33, 0.0 }
 0x3d6   :  { %v3968_v4 = vpop.f32.mrf.mxu0 }
 0x3d7   :  { %v3969_v37 = vadd.f32 %v3968_v4, %v3926_v32  ;;  %v3974_v41 = vmax.f32 %v3967_v36, 0.0 }
 0x3d8   :  { %v3970_v38 = vpop.f32.mrf.mxu0 }
 0x3d9   :  { %v3971_v39 = vadd.f32 %v3970_v38, %v3928_v35  ;;  %v3975_v40 = vmax.f32 %v3969_v37, 0.0 }
 0x3db   :  { %v3976_v42 = vmax.f32 %v3971_v39, 0.0  ;;  %v3977_v44 = vpack.c.bf16 %v3975_v40, %v3973_v43 }
 0x3dd   :  { %v3978_v15 = vpack.c.bf16 %v3976_v42, %v3974_v41 }
 0x3df   :  { %4146 = vmatprep.mubr.bf16.mxu1 %v3978_v15 }
 0x3e0   :  { %4147 = vmatmul.mubr.bf16.vlgmr.msra.gmra.mxu1 %v3977_v44 }
 0x4a0   :  { %v4743_v13 = vpop.f32.mrf.mxu1 }
 0x4a2   :  { %v4744_v46 = vpop.f32.mrf.mxu1 }
 0x4a3   :  { %v4745_v47 = vadd.f32 %v4744_v46, %v4743_v13 }
 0x4a4   :  { %v4746_v48 = vpop.f32.mrf.mxu1 }
 0x4a5   :  { %v4149_v49 = vadd.f32 %v4745_v47, %v4642_v45 }
 0x4a6   :  { %v4747_v51 = vpop.f32.mrf.mxu1 }
 0x4a7   :  { %4155 = vst [vmem:[%s5962_s9] sm:$0xff] %v4149_v49  ;;  %v4748_v52 = vadd.f32 %v4747_v51, %v4746_v48 }
 0x4a9   :  { %v4152_v53 = vadd.f32 %v4748_v52, %v4642_v45 }
 0x4ab   :  { %4156 = vst [vmem:[%s5962_s9 + $0x8] sm:$0xff] %v4152_v53 }
 0x4ac   :  { %4161 = vsyncpa [#allocation3], 1 }
 0x4ad   :  { %4162 = vsyncpa [#allocation5], 1 }

</bundles_post_ra>
